<compile_context>
chip_gen: v6e
topology: v6e:2x2x1
jax: 0.10.0
libtpu: 0.0.40
codegen_flags: <defaults>
</compile_context>

<pallas_src>
import math
import jax
import jax.numpy as jnp
from jax.experimental import pallas as pl
from jax.experimental.pallas import tpu as pltpu

# ----------------------------- model / packing constants -----------------------------
INPUT_DIM = 361
LATENT = 10
LANE = 128
IN_PAD = 384                        # 361 rounded up to 3*128 (lane-dense x / x_hat)
PRED_LANE = 2 * LATENT              # lane where `pred` lands inside the misc slab

# Encoder weight slab: [ ew1 | ew2 | ew3 | ew_mean|ew_var ]  -> (384, 512), bf16
ENC_ROWS, ENC_W = IN_PAD, 4 * LANE

# Fused decoder+predictor ("back") weight slab, bf16.  Each of the first three fused
# layers is 256 lanes wide ([dec | prd] block-diagonal); the fused head is 512 lanes
# wide ([x_hat(384) | pred-block(128)]).                      -> (256, 1280)
BK_ROWS = 2 * LANE
_BW1, _BW2, _BW3, _BW4 = 0, 2 * LANE, 4 * LANE, 6 * LANE
BK_W = _BW4 + IN_PAD + LANE         # 768 + 512 = 1280
P_OFF = LANE                        # predictor sub-block offset inside a fused layer

# Bias slab (f32, one row): encoder biases (4*128) then fused back-half biases.
_EB1, _EB2, _EB3, _EBMV = 0, LANE, 2 * LANE, 3 * LANE
_BB1, _BB2, _BB3, _BB4 = 4 * LANE, 6 * LANE, 8 * LANE, 10 * LANE
BIAS_W = _BB4ERR = None
BIAS_W = _BB4 + IN_PAD + LANE       # 1280 + 512 = 1792

# logical layer dims (reference / param init)
_LAYER_DIMS = [
    (INPUT_DIM, 90), (90, 70), (70, 40), (40, LATENT), (40, LATENT),   # encoder
    (LATENT, 40), (40, 70), (70, 90), (90, INPUT_DIM),                 # decoder
    (LATENT, 30), (30, 20), (20, 10), (10, 1),                         # predictor
]

# padded (actual MXU) matmul shapes, for the cost estimate
_PADDED_MATMULS = [
    (IN_PAD, LANE), (LANE, LANE), (LANE, LANE), (LANE, LANE),           # encoder
    (LANE, 2 * LANE), (2 * LANE, 2 * LANE), (2 * LANE, 2 * LANE),       # back 1..3
    (2 * LANE, IN_PAD + LANE),                                          # fused heads
]


def _softplus_beta3(x):
    # torch.nn.Softplus(beta=3, threshold=20): (1/3)*log(1+exp(3x)), linear when 3x > 20
    t = 3.0 * x
    safe = jnp.minimum(t, 20.0)
    return jnp.where(t > 20.0, x, jnp.log1p(jnp.exp(safe)) / 3.0)


# ----------------------------------- kernel -----------------------------------
def _model_kernel(x_ref, eps_ref, enc_ref, bk_ref, b_ref, xhat_ref, misc_ref):
    f32 = jnp.float32
    bf16 = jnp.bfloat16

    def dot(a, w):
        # bf16 MXU operands, f32 accumulation; element-wise math stays f32.
        return jnp.dot(a.astype(bf16), w, preferred_element_type=f32)

    def bias(lo, width=LANE):
        return b_ref[:, lo:lo + width]           # (1, width), broadcasts over batch

    sp = _softplus_beta3

    x = x_ref[...]                               # (Bt, 384) f32; lanes 361.. are zero

    # ---- Encoder (hidden widths padded to 128 lanes; padded activation lanes always
    #      hit zero weight rows in the next layer, so their softplus "junk" never leaks).
    h = sp(dot(x, enc_ref[:, 0:LANE]) + bias(_EB1))
    h = sp(dot(h, enc_ref[0:LANE, LANE:2 * LANE]) + bias(_EB2))
    h = sp(dot(h, enc_ref[0:LANE, 2 * LANE:3 * LANE]) + bias(_EB3))
    # fused FC_mean | FC_var head: lanes 0..9 = mean, 10..19 = log_var, rest = 0
    head = dot(h, enc_ref[0:LANE, 3 * LANE:4 * LANE]) + bias(_EBMV)      # (Bt, 128)

    # ---- Reparameterization, fully lane-dense (no narrow (Bt,10) slices):
    #      pltpu.roll brings log_var onto lanes 0..9; eps is zero outside lanes 0..9,
    #      so z[:, :10] = mean + exp(0.5*log_var)*eps.  Junk on lanes 10.. hits zero
    #      weight rows of the fused first back-half layer.
    log_var_at_0 = pltpu.roll(head, LANE - LATENT, 1)
    z = head + jnp.exp(0.5 * log_var_at_0) * eps_ref[...]                # (Bt, 128)

    # ---- Fused Decoder + Predictor (block-diagonal, 256-lane layers) ----
    d = sp(dot(z, bk_ref[0:LANE, _BW1:_BW1 + 2 * LANE]) + bias(_BB1, 2 * LANE))
    d = sp(dot(d, bk_ref[:, _BW2:_BW2 + 2 * LANE]) + bias(_BB2, 2 * LANE))
    d = sp(dot(d, bk_ref[:, _BW3:_BW3 + 2 * LANE]) + bias(_BB3, 2 * LANE))
    # fused heads: [ x_hat (384 lanes) | pred block (128 lanes, pred at lane 20) ]
    out = dot(d, bk_ref[:, _BW4:_BW4 + IN_PAD + LANE]) + bias(_BB4, IN_PAD + LANE)

    xhat_ref[...] = out[:, 0:IN_PAD]
    # misc = [ mean (0:10) | log_var (10:20) | pred (lane 20) | zeros ]
    misc_ref[...] = head + out[:, IN_PAD:IN_PAD + LANE]


# ----------------------------------- wrapper -----------------------------------
def _round_up(n, m):
    return ((n + m - 1) // m) * m


def _cdiv(a, b):
    return -(-a // b)


def pack_params(params):
    """params: flat list of 26 arrays (13 (W, b) pairs), W:(in,out), b:(1,out).
    Returns 3 slabs: enc_w (384,512) bf16, bk_w (256,1280) bf16, bias (1,1792) f32.
    All padding is zeros (layout invariant the kernel relies on)."""
    (ew1, eb1, ew2, eb2, ew3, eb3, ewm, ebm, ewv, ebv,
     dw1, db1, dw2, db2, dw3, db3, dw4, db4,
     pw1, pb1, pw2, pb2, pw3, pb3, pw4, pb4) = params

    # static layout-sanity checks (misc-slab packing must not collide)
    assert PRED_LANE >= 2 * LATENT
    assert 3 * LANE + 2 * LATENT <= ENC_W
    assert _BW4 + IN_PAD + LANE == BK_W and _BB4 + IN_PAD + LANE == BIAS_W

    f32 = jnp.float32

    enc = jnp.zeros((ENC_ROWS, ENC_W), f32)
    enc = enc.at[:INPUT_DIM, 0:90].set(ew1)
    enc = enc.at[:90, LANE:LANE + 70].set(ew2)
    enc = enc.at[:70, 2 * LANE:2 * LANE + 40].set(ew3)
    enc = enc.at[:40, 3 * LANE:3 * LANE + LATENT].set(ewm)
    enc = enc.at[:40, 3 * LANE + LATENT:3 * LANE + 2 * LATENT].set(ewv)

    bk = jnp.zeros((BK_ROWS, BK_W), f32)
    # fused layer 1: z -> [dec_h1 | prd_h1]   (only the first 128 rows are consumed)
    bk = bk.at[:LATENT, _BW1 + 0:_BW1 + 40].set(dw1)
    bk = bk.at[:LATENT, _BW1 + P_OFF:_BW1 + P_OFF + 30].set(pw1)
    # fused layer 2
    bk = bk.at[:40, _BW2 + 0:_BW2 + 70].set(dw2)
    bk = bk.at[P_OFF:P_OFF + 30, _BW2 + P_OFF:_BW2 + P_OFF + 20].set(pw2)
    # fused layer 3
    bk = bk.at[:70, _BW3 + 0:_BW3 + 90].set(dw3)
    bk = bk.at[P_OFF:P_OFF + 20, _BW3 + P_OFF:_BW3 + P_OFF + LATENT].set(pw3)
    # fused heads: [ x_hat (384) | pred block (pred at lane 20) ]
    bk = bk.at[:90, _BW4 + 0:_BW4 + INPUT_DIM].set(dw4)
    bk = bk.at[P_OFF:P_OFF + LATENT,
               _BW4 + IN_PAD + PRED_LANE:_BW4 + IN_PAD + PRED_LANE + 1].set(pw4)

    bias = jnp.zeros((1, BIAS_W), f32)
    bias = bias.at[:, _EB1:_EB1 + 90].set(eb1)
    bias = bias.at[:, _EB2:_EB2 + 70].set(eb2)
    bias = bias.at[:, _EB3:_EB3 + 40].set(eb3)
    bias = bias.at[:, _EBMV:_EBMV + LATENT].set(ebm)
    bias = bias.at[:, _EBMV + LATENT:_EBMV + 2 * LATENT].set(ebv)
    bias = bias.at[:, _BB1:_BB1 + 40].set(db1)
    bias = bias.at[:, _BB1 + P_OFF:_BB1 + P_OFF + 30].set(pb1)
    bias = bias.at[:, _BB2:_BB2 + 70].set(db2)
    bias = bias.at[:, _BB2 + P_OFF:_BB2 + P_OFF + 20].set(pb2)
    bias = bias.at[:, _BB3:_BB3 + 90].set(db3)
    bias = bias.at[:, _BB3 + P_OFF:_BB3 + P_OFF + LATENT].set(pb3)
    bias = bias.at[:, _BB4:_BB4 + INPUT_DIM].set(db4)
    bias = bias.at[:, _BB4 + IN_PAD + PRED_LANE:_BB4 + IN_PAD + PRED_LANE + 1].set(pb4)

    # value-level layout invariants (checked once at pack time, before bf16 cast):
    # the misc slab is head + prd-head, so the colliding lane ranges must be zero.
    assert bool(jnp.all(enc[:, 3 * LANE + 2 * LATENT:] == 0.0))
    assert bool(jnp.all(bk[:, _BW4 + IN_PAD:_BW4 + IN_PAD + PRED_LANE] == 0.0))
    assert bool(jnp.all(bias[:, _EBMV + 2 * LATENT:_BB1] == 0.0))

    return enc.astype(jnp.bfloat16), bk.astype(jnp.bfloat16), bias


def model_forward(x, eps, packed, *, batch_tile=256):
    """x: (B, 361) f32, eps: (B, 10) f32, packed: output of pack_params.
    Returns (x_hat (B,361), mean (B,10), log_var (B,10), pred (B,1))."""
    enc_w, bk_w, bias = packed
    B = x.shape[0]

    # Minimal-padding batch tiling: n_tiles grid steps of bt rows each (bt % 8 == 0).
    n_tiles = max(1, _cdiv(B, int(batch_tile)))
    bt = _round_up(_cdiv(B, n_tiles), 8)
    pb = n_tiles * bt

    # Two separate lane-aligned activation inputs (no combined slab build).
    xp = jnp.pad(x.astype(jnp.float32), ((0, pb - B), (0, IN_PAD - INPUT_DIM)))
    epsp = jnp.pad(eps.astype(jnp.float32), ((0, pb - B), (0, LANE - LATENT)))

    out_shape = (
        jax.ShapeDtypeStruct((pb, IN_PAD), jnp.float32),   # x_hat slab
        jax.ShapeDtypeStruct((pb, LANE), jnp.float32),     # misc slab: mean|log_var|pred
    )

    flops = 2 * pb * sum(k * n for k, n in _PADDED_MATMULS)
    transcend = pb * (2 * (3 * LANE + 3 * 2 * LANE) + LANE)    # softplus exp+log1p + reparam exp
    bytes_acc = (4 * (xp.size + epsp.size + pb * IN_PAD + pb * LANE + bias.size)
                 + 2 * (enc_w.size + bk_w.size))

    xhat_pad, misc = pl.pallas_call(
        _model_kernel,
        out_shape=out_shape,
        grid=(n_tiles,),
        in_specs=[
            pl.BlockSpec((bt, IN_PAD), lambda i: (i, 0)),        # x (batch-tiled)
            pl.BlockSpec((bt, LANE), lambda i: (i, 0)),          # eps (batch-tiled)
            pl.BlockSpec((ENC_ROWS, ENC_W), lambda i: (0, 0)),   # weights: VMEM-resident
            pl.BlockSpec((BK_ROWS, BK_W), lambda i: (0, 0)),
            pl.BlockSpec((1, BIAS_W), lambda i: (0, 0)),
        ],
        out_specs=(
            pl.BlockSpec((bt, IN_PAD), lambda i: (i, 0)),
            pl.BlockSpec((bt, LANE), lambda i: (i, 0)),
        ),
        compiler_params=pltpu.CompilerParams(
            dimension_semantics=("parallel",),
            vmem_limit_bytes=32 << 20,
        ),
        cost_estimate=pl.CostEstimate(
            flops=int(flops), transcendentals=int(transcend), bytes_accessed=int(bytes_acc)),
    )(xp, epsp, enc_w, bk_w, bias)

    x_hat = xhat_pad[:B, :INPUT_DIM]
    mean = misc[:B, 0:LATENT]
    log_var = misc[:B, LATENT:2 * LATENT]
    pred = misc[:B, PRED_LANE:PRED_LANE + 1]
    return x_hat, mean, log_var, pred


# ------------------------------ params / reference ------------------------------
def _make_linear(key, in_dim, out_dim):
    # Deterministic init mimicking torch.nn.Linear default: U(-1/sqrt(in), 1/sqrt(in))
    kw, kb = jax.random.split(key)
    bound = 1.0 / math.sqrt(in_dim)
    w = jax.random.uniform(kw, (in_dim, out_dim), jnp.float32, -bound, bound)
    b = jax.random.uniform(kb, (1, out_dim), jnp.float32, -bound, bound)
    return w, b


def make_params(key):
    keys = jax.random.split(key, len(_LAYER_DIMS))
    params = []
    for k, (din, dout) in zip(keys, _LAYER_DIMS):
        w, b = _make_linear(k, din, dout)
        params.extend([w, b])
    return params


def reference_forward(x, eps, params):
    """Pure-JAX f32 reference matching the PyTorch forward (correctness check)."""
    (ew1, eb1, ew2, eb2, ew3, eb3, ewm, ebm, ewv, ebv,
     dw1, db1, dw2, db2, dw3, db3, dw4, db4,
     pw1, pb1, pw2, pb2, pw3, pb3, pw4, pb4) = params
    sp = _softplus_beta3
    h = sp(x @ ew1 + eb1)
    h = sp(h @ ew2 + eb2)
    h = sp(h @ ew3 + eb3)
    mean = h @ ewm + ebm
    log_var = h @ ewv + ebv
    z = mean + jnp.exp(0.5 * log_var) * eps
    d = sp(z @ dw1 + db1)
    d = sp(d @ dw2 + db2)
    d = sp(d @ dw3 + db3)
    x_hat = d @ dw4 + db4
    p = sp(z @ pw1 + pb1)
    p = sp(p @ pw2 + pb2)
    p = sp(p @ pw3 + pb3)
    pred = p @ pw4 + pb4
    return x_hat, mean, log_var, pred


if __name__ == "__main__":
    BATCH = 8

    root = jax.random.PRNGKey(0)
    k_x, k_eps, k_params = jax.random.split(root, 3)

    x = jax.random.normal(k_x, (BATCH, INPUT_DIM), dtype=jnp.float32)
    # epsilon ~ N(0,1) for the reparameterization trick (torch.randn_like), generated
    # deterministically outside the kernel.
    eps = jax.random.normal(k_eps, (BATCH, LATENT), dtype=jnp.float32)

    params = make_params(k_params)
    packed = pack_params(params)

    outs = model_forward(x, eps, packed)
    jax.block_until_ready(outs)
    x_hat, mean, log_var, pred = outs

    assert x_hat.shape == (BATCH, INPUT_DIM)
    assert mean.shape == (BATCH, LATENT)
    assert log_var.shape == (BATCH, LATENT)
    assert pred.shape == (BATCH, 1)

    # Numerical sanity check against a pure-JAX f32 reference (loose tol: bf16 MXU operands).
    refs = reference_forward(x, eps, params)
    for got, ref in zip(outs, refs):
        assert bool(jnp.allclose(got, ref, atol=3e-2, rtol=3e-2)), float(
            jnp.max(jnp.abs(got - ref)))

    print("KERNEL_OK")
</pallas_src>

<mosaic_0001>
module attributes {stable_mosaic.version = 11 : i64} {
  func.func @_model_kernel(%arg0: i32, %arg1: memref<8x384xf32, #tpu.memory_space<vmem>>, %arg2: memref<8x128xf32, #tpu.memory_space<vmem>>, %arg3: memref<384x512xbf16, #tpu.memory_space<vmem>>, %arg4: memref<256x1280xbf16, #tpu.memory_space<vmem>>, %arg5: memref<1x1792xf32, #tpu.memory_space<vmem>>, %arg6: memref<8x384xf32, #tpu.memory_space<vmem>>, %arg7: memref<8x128xf32, #tpu.memory_space<vmem>>) attributes {dimension_semantics = [#tpu.dimension_semantics<parallel>], iteration_bounds = array<i64: 1>, scalar_prefetch = 0 : i64, scratch_operands = 0 : i64, tpu.core_type = #tpu.core_type<tc>, window_params = [{transform_indices = @transform_0, window_bounds = array<i64: 8, 384>}, {transform_indices = @transform_1, window_bounds = array<i64: 8, 128>}, {pipeline_mode = #tpu.pipeline_mode<synchronous>, transform_indices = @transform_2, window_bounds = array<i64: 384, 512>}, {pipeline_mode = #tpu.pipeline_mode<synchronous>, transform_indices = @transform_3, window_bounds = array<i64: 256, 1280>}, {pipeline_mode = #tpu.pipeline_mode<synchronous>, transform_indices = @transform_4, window_bounds = array<i64: 1, 1792>}, {transform_indices = @transform_5, window_bounds = array<i64: 8, 384>}, {transform_indices = @transform_6, window_bounds = array<i64: 8, 128>}]} {
    %c0 = arith.constant 0 : index
    %c0_0 = arith.constant 0 : index
    %0 = vector.load %arg1[%c0, %c0_0] : memref<8x384xf32, #tpu.memory_space<vmem>>, vector<8x384xf32>
    %c0_1 = arith.constant 0 : index
    %c0_2 = arith.constant 0 : index
    %1 = vector.load %arg3[%c0_1, %c0_2] : memref<384x512xbf16, #tpu.memory_space<vmem>>, vector<384x128xbf16>
    %2 = arith.truncf %0 : vector<8x384xf32> to vector<8x384xbf16>
    %cst = arith.constant dense<0.000000e+00> : vector<8x128xf32>
    %3 = tpu.matmul %2, %1, %cst {dimension_numbers = #tpu.dot_dimension_numbers<[1], [0], [0], [1], [0, 0, 1, 1], [], []>} : vector<8x384xbf16>, vector<384x128xbf16>, vector<8x128xf32> -> vector<8x128xf32>
    %c0_3 = arith.constant 0 : index
    %c0_4 = arith.constant 0 : index
    %4 = vector.load %arg5[%c0_3, %c0_4] : memref<1x1792xf32, #tpu.memory_space<vmem>>, vector<1x128xf32>
    %5 = vector.broadcast %4 : vector<1x128xf32> to vector<8x128xf32>
    %6 = arith.addf %3, %5 : vector<8x128xf32>
    %cst_5 = arith.constant 3.000000e+00 : f32
    %7 = vector.broadcast %cst_5 : f32 to vector<8x128xf32>
    %8 = arith.mulf %7, %6 : vector<8x128xf32>
    %cst_6 = arith.constant 2.000000e+01 : f32
    %9 = vector.broadcast %cst_6 : f32 to vector<8x128xf32>
    %10 = arith.minimumf %8, %9 : vector<8x128xf32>
    %cst_7 = arith.constant 2.000000e+01 : f32
    %11 = vector.broadcast %cst_7 : f32 to vector<8x128xf32>
    %12 = arith.cmpf ogt, %8, %11 : vector<8x128xf32>
    %13 = math.exp %10 : vector<8x128xf32>
    %14 = math.log1p %13 : vector<8x128xf32>
    %cst_8 = arith.constant 3.000000e+00 : f32
    %15 = vector.broadcast %cst_8 : f32 to vector<8x128xf32>
    %16 = arith.divf %14, %15 : vector<8x128xf32>
    %17 = arith.select %12, %6, %16 : vector<8x128xi1>, vector<8x128xf32>
    %c0_9 = arith.constant 0 : index
    %c128 = arith.constant 128 : index
    %18 = vector.load %arg3[%c0_9, %c128] : memref<384x512xbf16, #tpu.memory_space<vmem>>, vector<128x128xbf16>
    %19 = arith.truncf %17 : vector<8x128xf32> to vector<8x128xbf16>
    %cst_10 = arith.constant dense<0.000000e+00> : vector<8x128xf32>
    %20 = tpu.matmul %19, %18, %cst_10 {dimension_numbers = #tpu.dot_dimension_numbers<[1], [0], [0], [1], [0, 0, 1, 1], [], []>} : vector<8x128xbf16>, vector<128x128xbf16>, vector<8x128xf32> -> vector<8x128xf32>
    %c0_11 = arith.constant 0 : index
    %c128_12 = arith.constant 128 : index
    %21 = vector.load %arg5[%c0_11, %c128_12] : memref<1x1792xf32, #tpu.memory_space<vmem>>, vector<1x128xf32>
    %22 = vector.broadcast %21 : vector<1x128xf32> to vector<8x128xf32>
    %23 = arith.addf %20, %22 : vector<8x128xf32>
    %cst_13 = arith.constant 3.000000e+00 : f32
    %24 = vector.broadcast %cst_13 : f32 to vector<8x128xf32>
    %25 = arith.mulf %24, %23 : vector<8x128xf32>
    %cst_14 = arith.constant 2.000000e+01 : f32
    %26 = vector.broadcast %cst_14 : f32 to vector<8x128xf32>
    %27 = arith.minimumf %25, %26 : vector<8x128xf32>
    %cst_15 = arith.constant 2.000000e+01 : f32
    %28 = vector.broadcast %cst_15 : f32 to vector<8x128xf32>
    %29 = arith.cmpf ogt, %25, %28 : vector<8x128xf32>
    %30 = math.exp %27 : vector<8x128xf32>
    %31 = math.log1p %30 : vector<8x128xf32>
    %cst_16 = arith.constant 3.000000e+00 : f32
    %32 = vector.broadcast %cst_16 : f32 to vector<8x128xf32>
    %33 = arith.divf %31, %32 : vector<8x128xf32>
    %34 = arith.select %29, %23, %33 : vector<8x128xi1>, vector<8x128xf32>
    %c0_17 = arith.constant 0 : index
    %c256 = arith.constant 256 : index
    %35 = vector.load %arg3[%c0_17, %c256] : memref<384x512xbf16, #tpu.memory_space<vmem>>, vector<128x128xbf16>
    %36 = arith.truncf %34 : vector<8x128xf32> to vector<8x128xbf16>
    %cst_18 = arith.constant dense<0.000000e+00> : vector<8x128xf32>
    %37 = tpu.matmul %36, %35, %cst_18 {dimension_numbers = #tpu.dot_dimension_numbers<[1], [0], [0], [1], [0, 0, 1, 1], [], []>} : vector<8x128xbf16>, vector<128x128xbf16>, vector<8x128xf32> -> vector<8x128xf32>
    %c0_19 = arith.constant 0 : index
    %c256_20 = arith.constant 256 : index
    %38 = vector.load %arg5[%c0_19, %c256_20] : memref<1x1792xf32, #tpu.memory_space<vmem>>, vector<1x128xf32>
    %39 = vector.broadcast %38 : vector<1x128xf32> to vector<8x128xf32>
    %40 = arith.addf %37, %39 : vector<8x128xf32>
    %cst_21 = arith.constant 3.000000e+00 : f32
    %41 = vector.broadcast %cst_21 : f32 to vector<8x128xf32>
    %42 = arith.mulf %41, %40 : vector<8x128xf32>
    %cst_22 = arith.constant 2.000000e+01 : f32
    %43 = vector.broadcast %cst_22 : f32 to vector<8x128xf32>
    %44 = arith.minimumf %42, %43 : vector<8x128xf32>
    %cst_23 = arith.constant 2.000000e+01 : f32
    %45 = vector.broadcast %cst_23 : f32 to vector<8x128xf32>
    %46 = arith.cmpf ogt, %42, %45 : vector<8x128xf32>
    %47 = math.exp %44 : vector<8x128xf32>
    %48 = math.log1p %47 : vector<8x128xf32>
    %cst_24 = arith.constant 3.000000e+00 : f32
    %49 = vector.broadcast %cst_24 : f32 to vector<8x128xf32>
    %50 = arith.divf %48, %49 : vector<8x128xf32>
    %51 = arith.select %46, %40, %50 : vector<8x128xi1>, vector<8x128xf32>
    %c0_25 = arith.constant 0 : index
    %c384 = arith.constant 384 : index
    %52 = vector.load %arg3[%c0_25, %c384] : memref<384x512xbf16, #tpu.memory_space<vmem>>, vector<128x128xbf16>
    %53 = arith.truncf %51 : vector<8x128xf32> to vector<8x128xbf16>
    %cst_26 = arith.constant dense<0.000000e+00> : vector<8x128xf32>
    %54 = tpu.matmul %53, %52, %cst_26 {dimension_numbers = #tpu.dot_dimension_numbers<[1], [0], [0], [1], [0, 0, 1, 1], [], []>} : vector<8x128xbf16>, vector<128x128xbf16>, vector<8x128xf32> -> vector<8x128xf32>
    %c0_27 = arith.constant 0 : index
    %c384_28 = arith.constant 384 : index
    %55 = vector.load %arg5[%c0_27, %c384_28] : memref<1x1792xf32, #tpu.memory_space<vmem>>, vector<1x128xf32>
    %56 = vector.broadcast %55 : vector<1x128xf32> to vector<8x128xf32>
    %57 = arith.addf %54, %56 : vector<8x128xf32>
    %c118_i32 = arith.constant 118 : i32
    %58 = tpu.dynamic_rotate %57 by %c118_i32 dim 1 : vector<8x128xf32>, i32 -> vector<8x128xf32>
    %cst_29 = arith.constant 5.000000e-01 : f32
    %59 = vector.broadcast %cst_29 : f32 to vector<8x128xf32>
    %60 = arith.mulf %59, %58 : vector<8x128xf32>
    %61 = math.exp %60 : vector<8x128xf32>
    %c0_30 = arith.constant 0 : index
    %c0_31 = arith.constant 0 : index
    %62 = vector.load %arg2[%c0_30, %c0_31] : memref<8x128xf32, #tpu.memory_space<vmem>>, vector<8x128xf32>
    %63 = arith.mulf %61, %62 : vector<8x128xf32>
    %64 = arith.addf %57, %63 : vector<8x128xf32>
    %c0_32 = arith.constant 0 : index
    %c0_33 = arith.constant 0 : index
    %65 = vector.load %arg4[%c0_32, %c0_33] : memref<256x1280xbf16, #tpu.memory_space<vmem>>, vector<128x256xbf16>
    %66 = arith.truncf %64 : vector<8x128xf32> to vector<8x128xbf16>
    %cst_34 = arith.constant dense<0.000000e+00> : vector<8x256xf32>
    %67 = tpu.matmul %66, %65, %cst_34 {dimension_numbers = #tpu.dot_dimension_numbers<[1], [0], [0], [1], [0, 0, 1, 1], [], []>} : vector<8x128xbf16>, vector<128x256xbf16>, vector<8x256xf32> -> vector<8x256xf32>
    %c0_35 = arith.constant 0 : index
    %c512 = arith.constant 512 : index
    %68 = vector.load %arg5[%c0_35, %c512] : memref<1x1792xf32, #tpu.memory_space<vmem>>, vector<1x256xf32>
    %69 = vector.broadcast %68 : vector<1x256xf32> to vector<8x256xf32>
    %70 = arith.addf %67, %69 : vector<8x256xf32>
    %cst_36 = arith.constant 3.000000e+00 : f32
    %71 = vector.broadcast %cst_36 : f32 to vector<8x256xf32>
    %72 = arith.mulf %71, %70 : vector<8x256xf32>
    %cst_37 = arith.constant 2.000000e+01 : f32
    %73 = vector.broadcast %cst_37 : f32 to vector<8x256xf32>
    %74 = arith.minimumf %72, %73 : vector<8x256xf32>
    %cst_38 = arith.constant 2.000000e+01 : f32
    %75 = vector.broadcast %cst_38 : f32 to vector<8x256xf32>
    %76 = arith.cmpf ogt, %72, %75 : vector<8x256xf32>
    %77 = math.exp %74 : vector<8x256xf32>
    %78 = math.log1p %77 : vector<8x256xf32>
    %cst_39 = arith.constant 3.000000e+00 : f32
    %79 = vector.broadcast %cst_39 : f32 to vector<8x256xf32>
    %80 = arith.divf %78, %79 : vector<8x256xf32>
    %81 = arith.select %76, %70, %80 : vector<8x256xi1>, vector<8x256xf32>
    %c0_40 = arith.constant 0 : index
    %c256_41 = arith.constant 256 : index
    %82 = vector.load %arg4[%c0_40, %c256_41] : memref<256x1280xbf16, #tpu.memory_space<vmem>>, vector<256x256xbf16>
    %83 = arith.truncf %81 : vector<8x256xf32> to vector<8x256xbf16>
    %cst_42 = arith.constant dense<0.000000e+00> : vector<8x256xf32>
    %84 = tpu.matmul %83, %82, %cst_42 {dimension_numbers = #tpu.dot_dimension_numbers<[1], [0], [0], [1], [0, 0, 1, 1], [], []>} : vector<8x256xbf16>, vector<256x256xbf16>, vector<8x256xf32> -> vector<8x256xf32>
    %c0_43 = arith.constant 0 : index
    %c768 = arith.constant 768 : index
    %85 = vector.load %arg5[%c0_43, %c768] : memref<1x1792xf32, #tpu.memory_space<vmem>>, vector<1x256xf32>
    %86 = vector.broadcast %85 : vector<1x256xf32> to vector<8x256xf32>
    %87 = arith.addf %84, %86 : vector<8x256xf32>
    %cst_44 = arith.constant 3.000000e+00 : f32
    %88 = vector.broadcast %cst_44 : f32 to vector<8x256xf32>
    %89 = arith.mulf %88, %87 : vector<8x256xf32>
    %cst_45 = arith.constant 2.000000e+01 : f32
    %90 = vector.broadcast %cst_45 : f32 to vector<8x256xf32>
    %91 = arith.minimumf %89, %90 : vector<8x256xf32>
    %cst_46 = arith.constant 2.000000e+01 : f32
    %92 = vector.broadcast %cst_46 : f32 to vector<8x256xf32>
    %93 = arith.cmpf ogt, %89, %92 : vector<8x256xf32>
    %94 = math.exp %91 : vector<8x256xf32>
    %95 = math.log1p %94 : vector<8x256xf32>
    %cst_47 = arith.constant 3.000000e+00 : f32
    %96 = vector.broadcast %cst_47 : f32 to vector<8x256xf32>
    %97 = arith.divf %95, %96 : vector<8x256xf32>
    %98 = arith.select %93, %87, %97 : vector<8x256xi1>, vector<8x256xf32>
    %c0_48 = arith.constant 0 : index
    %c512_49 = arith.constant 512 : index
    %99 = vector.load %arg4[%c0_48, %c512_49] : memref<256x1280xbf16, #tpu.memory_space<vmem>>, vector<256x256xbf16>
    %100 = arith.truncf %98 : vector<8x256xf32> to vector<8x256xbf16>
    %cst_50 = arith.constant dense<0.000000e+00> : vector<8x256xf32>
    %101 = tpu.matmul %100, %99, %cst_50 {dimension_numbers = #tpu.dot_dimension_numbers<[1], [0], [0], [1], [0, 0, 1, 1], [], []>} : vector<8x256xbf16>, vector<256x256xbf16>, vector<8x256xf32> -> vector<8x256xf32>
    %c0_51 = arith.constant 0 : index
    %c1024 = arith.constant 1024 : index
    %102 = vector.load %arg5[%c0_51, %c1024] : memref<1x1792xf32, #tpu.memory_space<vmem>>, vector<1x256xf32>
    %103 = vector.broadcast %102 : vector<1x256xf32> to vector<8x256xf32>
    %104 = arith.addf %101, %103 : vector<8x256xf32>
    %cst_52 = arith.constant 3.000000e+00 : f32
    %105 = vector.broadcast %cst_52 : f32 to vector<8x256xf32>
    %106 = arith.mulf %105, %104 : vector<8x256xf32>
    %cst_53 = arith.constant 2.000000e+01 : f32
    %107 = vector.broadcast %cst_53 : f32 to vector<8x256xf32>
    %108 = arith.minimumf %106, %107 : vector<8x256xf32>
    %cst_54 = arith.constant 2.000000e+01 : f32
    %109 = vector.broadcast %cst_54 : f32 to vector<8x256xf32>
    %110 = arith.cmpf ogt, %106, %109 : vector<8x256xf32>
    %111 = math.exp %108 : vector<8x256xf32>
    %112 = math.log1p %111 : vector<8x256xf32>
    %cst_55 = arith.constant 3.000000e+00 : f32
    %113 = vector.broadcast %cst_55 : f32 to vector<8x256xf32>
    %114 = arith.divf %112, %113 : vector<8x256xf32>
    %115 = arith.select %110, %104, %114 : vector<8x256xi1>, vector<8x256xf32>
    %c0_56 = arith.constant 0 : index
    %c768_57 = arith.constant 768 : index
    %116 = vector.load %arg4[%c0_56, %c768_57] : memref<256x1280xbf16, #tpu.memory_space<vmem>>, vector<256x512xbf16>
    %117 = arith.truncf %115 : vector<8x256xf32> to vector<8x256xbf16>
    %cst_58 = arith.constant dense<0.000000e+00> : vector<8x512xf32>
    %118 = tpu.matmul %117, %116, %cst_58 {dimension_numbers = #tpu.dot_dimension_numbers<[1], [0], [0], [1], [0, 0, 1, 1], [], []>} : vector<8x256xbf16>, vector<256x512xbf16>, vector<8x512xf32> -> vector<8x512xf32>
    %c0_59 = arith.constant 0 : index
    %c1280 = arith.constant 1280 : index
    %119 = vector.load %arg5[%c0_59, %c1280] : memref<1x1792xf32, #tpu.memory_space<vmem>>, vector<1x512xf32>
    %120 = vector.broadcast %119 : vector<1x512xf32> to vector<8x512xf32>
    %121 = arith.addf %118, %120 : vector<8x512xf32>
    %122 = vector.extract_strided_slice %121 {offsets = [0, 0], sizes = [8, 384], strides = [1, 1]} : vector<8x512xf32> to vector<8x384xf32>
    %c0_60 = arith.constant 0 : index
    %c0_61 = arith.constant 0 : index
    %123 = vector.load %arg6[%c0_60, %c0_61] : memref<8x384xf32, #tpu.memory_space<vmem>>, vector<8x384xf32>
    tpu.vector_store %arg6[%c0_60, %c0_61], %122 {strides = array<i32>} : memref<8x384xf32, #tpu.memory_space<vmem>>, vector<8x384xf32>,
    %124 = vector.extract_strided_slice %121 {offsets = [0, 384], sizes = [8, 128], strides = [1, 1]} : vector<8x512xf32> to vector<8x128xf32>
    %125 = arith.addf %57, %124 : vector<8x128xf32>
    %c0_62 = arith.constant 0 : index
    %c0_63 = arith.constant 0 : index
    %126 = vector.load %arg7[%c0_62, %c0_63] : memref<8x128xf32, #tpu.memory_space<vmem>>, vector<8x128xf32>
    tpu.vector_store %arg7[%c0_62, %c0_63], %125 {strides = array<i32>} : memref<8x128xf32, #tpu.memory_space<vmem>>, vector<8x128xf32>,
    return
  }
  func.func @transform_0(%arg0: i32) -> (i32, i32) {
    %c0_i32 = arith.constant 0 : i32
    %c0_i32_0 = arith.constant 0 : i32
    return %arg0, %c0_i32 : i32, i32
  }
  func.func @transform_1(%arg0: i32) -> (i32, i32) {
    %c0_i32 = arith.constant 0 : i32
    %c0_i32_0 = arith.constant 0 : i32
    return %arg0, %c0_i32 : i32, i32
  }
  func.func @transform_2(%arg0: i32) -> (i32, i32) {
    %c0_i32 = arith.constant 0 : i32
    %c0_i32_0 = arith.constant 0 : i32
    %c0_i32_1 = arith.constant 0 : i32
    return %c0_i32, %c0_i32_0 : i32, i32
  }
  func.func @transform_3(%arg0: i32) -> (i32, i32) {
    %c0_i32 = arith.constant 0 : i32
    %c0_i32_0 = arith.constant 0 : i32
    %c0_i32_1 = arith.constant 0 : i32
    return %c0_i32, %c0_i32_0 : i32, i32
  }
  func.func @transform_4(%arg0: i32) -> (i32, i32) {
    %c0_i32 = arith.constant 0 : i32
    %c0_i32_0 = arith.constant 0 : i32
    %c0_i32_1 = arith.constant 0 : i32
    return %c0_i32, %c0_i32_0 : i32, i32
  }
  func.func @transform_5(%arg0: i32) -> (i32, i32) {
    %c0_i32 = arith.constant 0 : i32
    %c0_i32_0 = arith.constant 0 : i32
    return %arg0, %c0_i32 : i32, i32
  }
  func.func @transform_6(%arg0: i32) -> (i32, i32) {
    %c0_i32 = arith.constant 0 : i32
    %c0_i32_0 = arith.constant 0 : i32
    return %arg0, %c0_i32 : i32, i32
  }
}

</mosaic_0001>

<bundles_post_ra>
// kernel: tpu_custom_call.1
= control target key start
LH: loop header
LB: loop body
LE: loop exit
PB: predicated region body
PF: predicated region fallthrough
CT: control target
= control target key end

     0   :  { %12 = vsyncpa [#allocation3], 0  ;;  %s2966_s0 = inlined_call_operand.hbm [shape: f32[8,384], index: 0, kind: input, shape index: {}]   ;;  %s2967_s1 = inlined_call_operand.hbm [shape: f32[8,128], index: 1, kind: input, shape index: {}]   ;;  %s2968_s2 = inlined_call_operand.hbm [shape: bf16[384,512], index: 2, kind: input, shape index: {}]   ;;  %s2969_s3 = inlined_call_operand.hbm [shape: bf16[256,1280], index: 3, kind: input, shape index: {}]   ;;  %s2970_s4 = inlined_call_operand.hbm [shape: f32[1,1792], index: 4, kind: input, shape index: {}]   ;;  %s2971_s5 = inlined_call_operand.hbm [shape: f32[8,384], index: 5, kind: output, shape index: {0}]   ;;  %s2972_s6 = inlined_call_operand.hbm [shape: f32[8,128], index: 6, kind: output, shape index: {1}]  }
   0x1   :  { %13 = vsyncpa [#allocation6], 0 }
   0x2   :  { %14 = vsyncpa [#allocation9], 0 }
   0x3   :  { %15 = vsyncpa [#allocation4], 0 }
   0x4   :  { %16 = vsyncpa [#allocation13], 0  ;;  %s2832_s21 = smov [#allocation5]   ;;  %s2833_s23 = smov [#allocation8]  }
   0x5   :  { %s33_s22 = sshll.u32 %s2832_s21, 4  ;;  %s54_s24 = sshll.u32 %s2833_s23, 4  ;;  %s34_s22 = int_to_ptr.vmem [resolvable:$true] %s33_s22  ;;  %s55_s24 = int_to_ptr.vmem [resolvable:$true] %s54_s24 }
   0x6   :  { %s2690_s25 = scalar_lea.vmem %s34_s22, 128  ;;  %p2695_p1 = scmp.lt.s32.totalorder %s34_s22, %s34_s22 }
   0x7   :  { %p2691_p0 = scmp.ne.s32.totalorder %s34_s22, %s2690_s25  ;;  %p2696_p2 = scmp.lt.s32.totalorder %s2690_s25, %s2690_s25 }
   0x9   :  { %p2697_p3 = por %p2696_p2, %p2695_p1 }
   0xb   :  { %p2698_p4 = pnand %p2697_p3, %p2691_p0 }
   0xd   :  { %2701 = shalt.err (!%p2698_p4)
}
   0xe   :  { %36 = dma.hbm_to_vmem [thread:$0]  %s2967_s1, 128, %s34_s22, [#allocation6]  }
   0xf   :  { %s2710_s28 = scalar_lea.vmem %s55_s24, 20480  ;;  %p2715_p6 = scmp.lt.s32.totalorder %s55_s24, %s55_s24 }
  0x10   :  { %p2711_p5 = scmp.ne.s32.totalorder %s55_s24, %s2710_s28  ;;  %p2716_p7 = scmp.lt.s32.totalorder %s2710_s28, %s2710_s28 }
  0x12   :  { %p2717_p8 = por %p2716_p7, %p2715_p6 }
  0x14   :  { %p2718_p9 = pnand %p2717_p8, %p2711_p5 }
  0x16   :  { %2721 = shalt.err (!%p2718_p9)
}
  0x17   :  { %s2834_s29 = smov 640   ;;  %s2835_s30 = smov 40  }
  0x18   :  { %60 = dma.hbm_to_vmem [thread:$0]  %s2969_s3, 20480, %s55_s24, [#allocation9], %s2834_s29, %s2834_s29, %s2835_s30  }
  0x19   :  { %s2836_s9 = smov [#allocation2]   ;;  %s2837_s11 = smov [#allocation7]  }
  0x1a   :  { %s23_s10 = sshll.u32 %s2836_s9, 4  ;;  %s42_s12 = sshll.u32 %s2837_s11, 4  ;;  %s24_s10 = int_to_ptr.vmem [resolvable:$true] %s23_s10  ;;  %s43_s12 = int_to_ptr.vmem [resolvable:$true] %s42_s12 }
  0x1b   :  { %s2730_s1 = scalar_lea.vmem %s24_s10, 384  ;;  %p2735_p11 = scmp.lt.s32.totalorder %s24_s10, %s24_s10 }
  0x1c   :  { %p2731_p10 = scmp.ne.s32.totalorder %s24_s10, %s2730_s1  ;;  %p2736_p12 = scmp.lt.s32.totalorder %s2730_s1, %s2730_s1 }
  0x1e   :  { %p2737_p13 = por %p2736_p12, %p2735_p11 }
  0x20   :  { %p2738_p0 = pnand %p2737_p13, %p2731_p10 }
  0x22   :  { %2741 = shalt.err (!%p2738_p0)
}
  0x23   :  { %26 = dma.hbm_to_vmem [thread:$0]  %s2966_s0, 384, %s24_s10, [#allocation3]  }
  0x24   :  { %s2750_s15 = scalar_lea.vmem %s43_s12, 12288  ;;  %p2755_p2 = scmp.lt.s32.totalorder %s43_s12, %s43_s12 }
  0x25   :  { %p2751_p1 = scmp.ne.s32.totalorder %s43_s12, %s2750_s15  ;;  %p2756_p3 = scmp.lt.s32.totalorder %s2750_s15, %s2750_s15 }
  0x27   :  { %p2757_p4 = por %p2756_p3, %p2755_p2 }
  0x29   :  { %p2758_p5 = pnand %p2757_p4, %p2751_p1 }
  0x2b   :  { %2761 = shalt.err (!%p2758_p5)
}
  0x2c   :  { %s2838_s3 = smov 256   ;;  %s2839_s16 = smov 16  }
  0x2d   :  { %48 = dma.hbm_to_vmem [thread:$0]  %s2968_s2, 12288, %s43_s12, [#allocation6], %s2838_s3, %s2838_s3, %s2839_s16  }
  0x2e   :  { %s2840_s19 = smov [#allocation10]  }
  0x2f   :  { %s67_s20 = sshll.u32 %s2840_s19, 4  ;;  %s68_s20 = int_to_ptr.vmem [resolvable:$true] %s67_s20 }
  0x30   :  { %s2770_s21 = scalar_lea.vmem %s68_s20, 224  ;;  %p2775_p7 = scmp.lt.s32.totalorder %s68_s20, %s68_s20 }
  0x31   :  { %p2771_p6 = scmp.ne.s32.totalorder %s68_s20, %s2770_s21  ;;  %p2776_p8 = scmp.lt.s32.totalorder %s2770_s21, %s2770_s21 }
  0x33   :  { %p2777_p9 = por %p2776_p8, %p2775_p7 }
  0x35   :  { %p2778_p10 = pnand %p2777_p9, %p2771_p6 }
  0x37   :  { %2781 = shalt.err (!%p2778_p10)
}
  0x38   :  { %70 = dma.hbm_to_vmem [thread:$0]  %s2970_s4, 224, %s68_s20, [#allocation9]  }
  0x39   :  { %2822 = dma.done.wait [#allocation3], 384  }
  0x3a   :  { %2823 = vsyncadd [#allocation3], 4294966912 }
  0x3b   :  { %2824 = dma.done.wait [#allocation6], 12416  }
  0x3c   :  { %2825 = vsyncadd [#allocation6], 4294954880 }
  0x3d   :  { %2826 = dma.done.wait [#allocation9], 20704  }
  0x3e   :  { %2827 = vsyncadd [#allocation9], 4294946592  ;;  %v2841_v0 = vmov 0.0   ;;  %vm2842_vm0 = vmmov 0   ;;  %v2380_v1 = vld [vmem:[#allocation7 + $0x1e0] ss:$16 sps:$4 sm:$0xff]  }
  0x3f   :  { %2285 = vmatprep.subr.bf16.mxu1 %v2841_v0  ;;  %2301 = vmatprep.mubr.msk.bf16.mxu1 %vm2842_vm0, %v2841_v0  ;;  %v2381_v2 = vld [vmem:[#allocation7 + $0xe0] ss:$16 sps:$4 sm:$0xff]   ;;  %v88_v23 = vld [vmem:[#allocation2 + $0x8] sm:$0xff]  ;;  %v2404_v31 = vld [vmem:[#allocation7 + $0xe4] ss:$16 sps:$4 sm:$0xff]   ;;  %s2844_s2 = smov 118  }
  0x40   :  { %2227 = vmatprep.subr.bf16.mxu0 %v2380_v1  ;;  %v2382_v3 = vld [vmem:[#allocation7 + $0x2e0] ss:$16 sps:$4 sm:$0xff]   ;;  %v139_v25 = vpack.c.bf16 %v88_v23, %v88_v23  ;;  %v2405_v32 = vld [vmem:[#allocation7 + $0xc4] ss:$16 sps:$4 sm:$0xff]   ;;  %s2845_s4 = smov [#allocation11]   ;;  %s2846_s24 = smov [#allocation12]  }
  0x41   :  { %2228 = vmatpush3.bf16.msra.mxu0 %v2381_v2  ;;  %v2383_v4 = vld [vmem:[#allocation7 + $0x1c0] ss:$16 sps:$4 sm:$0xff]   ;;  %2286 = vmatpush3.bf16.msra.mxu1 %v2382_v3  ;;  %v2406_v33 = vld [vmem:[#allocation7 + $0xa4] ss:$16 sps:$4 sm:$0xff]   ;;  %v2412_v3 = vld [vmem:[#allocation7 + $0xe8] ss:$16 sps:$4 sm:$0xff]  }
  0x42   :  { %v2384_v5 = vld [vmem:[#allocation7 + $0xc0] ss:$16 sps:$4 sm:$0xff]   ;;  %2229 = vmatprep.subr.bf16.mxu0 %v2383_v4  ;;  %2287 = vmatprep.subr.bf16.mxu1 %v2841_v0  ;;  %v2407_v34 = vld [vmem:[#allocation7 + $0x84] ss:$16 sps:$4 sm:$0xff]   ;;  %v2413_v4 = vld [vmem:[#allocation7 + $0xc8] ss:$16 sps:$4 sm:$0xff]  }
  0x43   :  { %v2385_v6 = vld [vmem:[#allocation7 + $0x2c0] ss:$16 sps:$4 sm:$0xff]   ;;  %324 = vmatprep.mubr.bf16.mxu0 %v139_v25  ;;  %v2408_v35 = vld [vmem:[#allocation7 + $0x64] ss:$16 sps:$4 sm:$0xff]   ;;  %s2006_s23 = sshll.u32 %s2845_s4, 4  ;;  %s2016_s25 = sshll.u32 %s2846_s24, 4  ;;  %s2007_s23 = int_to_ptr.vmem [resolvable:$true] %s2006_s23  ;;  %s2017_s25 = int_to_ptr.vmem [resolvable:$true] %s2016_s25 }
  0x44   :  { %v2386_v7 = vld [vmem:[#allocation7 + $0x1a0] ss:$16 sps:$4 sm:$0xff]   ;;  %v2409_v36 = vld [vmem:[#allocation7 + $0x44] ss:$16 sps:$4 sm:$0xff]   ;;  %s2782_s26 = scalar_lea.vmem %s2007_s23, 384  ;;  %p2787_p12 = scmp.lt.s32.totalorder %s2007_s23, %s2007_s23 }
  0x45   :  { %2230 = vmatpush3.bf16.msra.mxu0 %v2384_v5  ;;  %v2387_v8 = vld [vmem:[#allocation7 + $0xa0] ss:$16 sps:$4 sm:$0xff]   ;;  %2288 = vmatpush3.bf16.msra.mxu1 %v2385_v6  ;;  %v2410_v37 = vld [vmem:[#allocation7 + $0x24] ss:$16 sps:$4 sm:$0xff]   ;;  %v2414_v5 = vld [vmem:[#allocation7 + $0xa8] ss:$16 sps:$4 sm:$0xff]   ;;  %p2783_p11 = scmp.ne.s32.totalorder %s2007_s23, %s2782_s26  ;;  %p2788_p13 = scmp.lt.s32.totalorder %s2782_s26, %s2782_s26 }
  0x46   :  { %2231 = vmatprep.subr.bf16.mxu0 %v2386_v7  ;;  %v2388_v9 = vld [vmem:[#allocation7 + $0x2a0] ss:$16 sps:$4 sm:$0xff]   ;;  %2289 = vmatprep.subr.bf16.mxu1 %v2841_v0  ;;  %v2411_v38 = vld [vmem:[#allocation7 + $0x4] ss:$16 sps:$4 sm:$0xff]   ;;  %v2415_v6 = vld [vmem:[#allocation7 + $0x88] ss:$16 sps:$4 sm:$0xff]  }
  0x47   :  { %v2389_v10 = vld [vmem:[#allocation7 + $0x180] ss:$16 sps:$4 sm:$0xff]   ;;  %v2416_v7 = vld [vmem:[#allocation7 + $0x68] ss:$16 sps:$4 sm:$0xff]   ;;  %p2789_p0 = por %p2788_p13, %p2787_p12 }
  0x48   :  { %v2390_v11 = vld [vmem:[#allocation7 + $0x80] ss:$16 sps:$4 sm:$0xff]  }
  0x49   :  { %2232 = vmatpush3.bf16.msra.mxu0 %v2387_v8  ;;  %v2391_v12 = vld [vmem:[#allocation7 + $0x280] ss:$16 sps:$4 sm:$0xff]   ;;  %2290 = vmatpush3.bf16.msra.mxu1 %v2388_v9  ;;  %v2417_v8 = vld [vmem:[#allocation7 + $0x48] ss:$16 sps:$4 sm:$0xff]   ;;  %p2790_p1 = pnand %p2789_p0, %p2783_p11 }
  0x4a   :  { %2233 = vmatprep.subr.bf16.mxu0 %v2389_v10  ;;  %v2392_v13 = vld [vmem:[#allocation7 + $0x160] ss:$16 sps:$4 sm:$0xff]   ;;  %2291 = vmatprep.subr.bf16.mxu1 %v2841_v0  ;;  %v2418_v9 = vld [vmem:[#allocation7 + $0x28] ss:$16 sps:$4 sm:$0xff]  }
  0x4b   :  { %v2393_v14 = vld [vmem:[#allocation7 + $0x60] ss:$16 sps:$4 sm:$0xff]   ;;  %v2419_v10 = vld [vmem:[#allocation7 + $0x8] ss:$16 sps:$4 sm:$0xff]  }
  0x4c   :  { %v2394_v15 = vld [vmem:[#allocation7 + $0x260] ss:$16 sps:$4 sm:$0xff]  }
  0x4d   :  { %2234 = vmatpush3.bf16.msra.mxu0 %v2390_v11  ;;  %2292 = vmatpush3.bf16.msra.mxu1 %v2391_v12  ;;  %v2395_v16 = vld [vmem:[#allocation7 + $0x140] ss:$16 sps:$4 sm:$0xff]  }
  0x4e   :  { %2235 = vmatprep.subr.bf16.mxu0 %v2392_v13  ;;  %2293 = vmatprep.subr.bf16.mxu1 %v2841_v0  ;;  %v2396_v17 = vld [vmem:[#allocation7 + $0x40] ss:$16 sps:$4 sm:$0xff]  }
  0x4f   :  { %v2397_v18 = vld [vmem:[#allocation7 + $0x240] ss:$16 sps:$4 sm:$0xff]  }
  0x50   :  { %v2398_v19 = vld [vmem:[#allocation7 + $0x120] ss:$16 sps:$4 sm:$0xff]  }
  0x51   :  { %2236 = vmatpush3.bf16.msra.mxu0 %v2393_v14  ;;  %2294 = vmatpush3.bf16.msra.mxu1 %v2394_v15  ;;  %v2399_v20 = vld [vmem:[#allocation7 + $0x20] ss:$16 sps:$4 sm:$0xff]  }
  0x52   :  { %2237 = vmatprep.subr.bf16.mxu0 %v2395_v16  ;;  %2295 = vmatprep.subr.bf16.mxu1 %v2841_v0  ;;  %v2400_v21 = vld [vmem:[#allocation7 + $0x220] ss:$16 sps:$4 sm:$0xff]  }
  0x53   :  { %v2401_v22 = vld [vmem:[#allocation7 + $0x100] ss:$16 sps:$4 sm:$0xff]  }
  0x54   :  { %v2402_v24 = vld [vmem:[#allocation7] ss:$16 sps:$4 sm:$0xff]  }
  0x55   :  { %2238 = vmatpush3.bf16.msra.mxu0 %v2396_v17  ;;  %2296 = vmatpush3.bf16.msra.mxu1 %v2397_v18  ;;  %v87_v26 = vld [vmem:[#allocation2] sm:$0xff]  ;;  %v89_v28 = vld [vmem:[#allocation2 + $0x10] sm:$0xff] }
  0x56   :  { %2239 = vmatprep.subr.bf16.mxu0 %v2398_v19  ;;  %2297 = vmatprep.subr.bf16.mxu1 %v2841_v0  ;;  %v2403_v27 = vld [vmem:[#allocation7 + $0x200] ss:$16 sps:$4 sm:$0xff]   ;;  %v138_v29 = vpack.c.bf16 %v87_v26, %v87_v26  ;;  %v140_v30 = vpack.c.bf16 %v89_v28, %v89_v28 }
  0x57   :  { %v2031_v41 = vld [vmem:[#allocation10] ss:$0 sm:$0xff]  ;;  %v2056_v11 = vld [vmem:[#allocation10 + $0x1] ss:$0 sm:$0xff] }
  0x59   :  { %2240 = vmatpush3.bf16.msra.mxu0 %v2399_v20  ;;  %2298 = vmatpush3.bf16.msra.mxu1 %v2400_v21 }
  0x5a   :  { %2241 = vmatprep.subr.bf16.mxu0 %v2401_v22  ;;  %2299 = vmatprep.subr.bf16.mxu1 %v2841_v0 }
  0x5d   :  { %2242 = vmatpush3.bf16.msra.mxu0 %v2402_v24  ;;  %2300 = vmatpush3.bf16.msra.mxu1 %v2403_v27 }
  0x5e   :  { %2305 = vmatprep.subr.bf16.mxu0 %v2841_v0  ;;  %2325 = vmatprep.subr.bf16.mxu1 %v2841_v0 }
  0x60   :  { %325 = vmatmul.mubr.bf16.vlgmr.msra.gmra.mxu0 %v138_v29  ;;  %2302 = vmatmul.mubr.bf16.vlgmr.msra.gmra.mxu1 %v140_v30 }
  0x61   :  { %2321 = vmatprep.mubr.msk.bf16.mxu0 %vm2842_vm0, %v2841_v0  ;;  %2341 = vmatprep.mubr.msk.bf16.mxu1 %vm2842_vm0, %v2841_v0 }
  0x62   :  { %2306 = vmatpush3.bf16.msra.mxu0 %v2404_v31  ;;  %2326 = vmatpush3.bf16.msra.mxu1 %v2412_v3  ;;  %v2439_v3 = vld [vmem:[#allocation8 + $0x144] ss:$40 sps:$4 sm:$0xff]  }
  0x63   :  { %2307 = vmatprep.subr.bf16.mxu0 %v2841_v0  ;;  %2327 = vmatprep.subr.bf16.mxu1 %v2841_v0 }
  0x66   :  { %2308 = vmatpush3.bf16.msra.mxu0 %v2405_v32  ;;  %2328 = vmatpush3.bf16.msra.mxu1 %v2413_v4  ;;  %v2420_v32 = vld [vmem:[#allocation7 + $0xec] ss:$16 sps:$4 sm:$0xff]   ;;  %v2437_v4 = vld [vmem:[#allocation8 + $0x140] ss:$40 sps:$4 sm:$0xff]  }
  0x67   :  { %2309 = vmatprep.subr.bf16.mxu0 %v2841_v0  ;;  %2329 = vmatprep.subr.bf16.mxu1 %v2841_v0 }
  0x6a   :  { %2310 = vmatpush3.bf16.msra.mxu0 %v2406_v33  ;;  %2330 = vmatpush3.bf16.msra.mxu1 %v2414_v5  ;;  %v2421_v33 = vld [vmem:[#allocation7 + $0xcc] ss:$16 sps:$4 sm:$0xff]  }
  0x6b   :  { %2311 = vmatprep.subr.bf16.mxu0 %v2841_v0  ;;  %2331 = vmatprep.subr.bf16.mxu1 %v2841_v0  ;;  %v2442_v5 = vld [vmem:[#allocation8 + $0xf4] ss:$40 sps:$4 sm:$0xff]  }
  0x6e   :  { %2312 = vmatpush3.bf16.msra.mxu0 %v2407_v34  ;;  %2332 = vmatpush3.bf16.msra.mxu1 %v2415_v6  ;;  %v2422_v34 = vld [vmem:[#allocation7 + $0xac] ss:$16 sps:$4 sm:$0xff]   ;;  %v2440_v6 = vld [vmem:[#allocation8 + $0xf0] ss:$40 sps:$4 sm:$0xff]  }
  0x6f   :  { %2313 = vmatprep.subr.bf16.mxu0 %v2841_v0  ;;  %2333 = vmatprep.subr.bf16.mxu1 %v2841_v0 }
  0x72   :  { %2314 = vmatpush3.bf16.msra.mxu0 %v2408_v35  ;;  %2334 = vmatpush3.bf16.msra.mxu1 %v2416_v7  ;;  %v2423_v35 = vld [vmem:[#allocation7 + $0x8c] ss:$16 sps:$4 sm:$0xff]  }
  0x73   :  { %2315 = vmatprep.subr.bf16.mxu0 %v2841_v0  ;;  %2335 = vmatprep.subr.bf16.mxu1 %v2841_v0  ;;  %v2445_v7 = vld [vmem:[#allocation8 + $0xa4] ss:$40 sps:$4 sm:$0xff]  }
  0x76   :  { %2316 = vmatpush3.bf16.msra.mxu0 %v2409_v36  ;;  %2336 = vmatpush3.bf16.msra.mxu1 %v2417_v8  ;;  %v2424_v36 = vld [vmem:[#allocation7 + $0x6c] ss:$16 sps:$4 sm:$0xff]   ;;  %v2074_v8 = vld [vmem:[#allocation10 + $0x3] ss:$0 sm:$0xff] }
  0x77   :  { %2317 = vmatprep.subr.bf16.mxu0 %v2841_v0  ;;  %2337 = vmatprep.subr.bf16.mxu1 %v2841_v0 }
  0x7a   :  { %2318 = vmatpush3.bf16.msra.mxu0 %v2410_v37  ;;  %2338 = vmatpush3.bf16.msra.mxu1 %v2418_v9  ;;  %v2425_v37 = vld [vmem:[#allocation7 + $0x4c] ss:$16 sps:$4 sm:$0xff]   ;;  %v2843_v9 = vmov 0  }
  0x7b   :  { %2319 = vmatprep.subr.bf16.mxu0 %v2841_v0  ;;  %2339 = vmatprep.subr.bf16.mxu1 %v2841_v0 }
  0x7e   :  { %2320 = vmatpush3.bf16.msra.mxu0 %v2411_v38  ;;  %2340 = vmatpush3.bf16.msra.mxu1 %v2419_v10  ;;  %v2426_v38 = vld [vmem:[#allocation7 + $0x2c] ss:$16 sps:$4 sm:$0xff]  }
  0x7f   :  { %2345 = vmatprep.subr.bf16.mxu0 %v2841_v0 }
 0x120   :  { %v2243_v39 = vpop.f32.mrf.mxu0  ;;  %v366_v40 = vpop.f32.mrf.mxu1 }
 0x122   :  { %v2244_v42 = vpop.f32.mrf.mxu0  ;;  %v2303_v44 = vpop.f32.mrf.mxu1 }
 0x123   :  { %v2245_v43 = vadd.f32 %v2244_v42, %v2243_v39  ;;  %v2427_v39 = vld [vmem:[#allocation7 + $0xc] ss:$16 sps:$4 sm:$0xff]  }
 0x124   :  { %v2246_v45 = vpop.f32.mrf.mxu0  ;;  %v369_v47 = vpop.f32.mrf.mxu1 }
 0x125   :  { %v327_v46 = vadd.f32 %v2245_v43, %v2031_v41 }
 0x126   :  { %v2247_v48 = vpop.f32.mrf.mxu0  ;;  %v2304_v50 = vpop.f32.mrf.mxu1 }
 0x127   :  { %v367_v49 = vadd.f32 %v366_v40, %v327_v46  ;;  %v2065_v40 = vld [vmem:[#allocation10 + $0x2] ss:$0 sm:$0xff] }
 0x129   :  { %v372_v51 = vmul.f32 3.0, %v367_v49 }
 0x12b   :  { %v373_v52 = vmin.f32 %v372_v51, 20.0  ;;  %vm374_vm2 = vcmp.gt.f32.partialorder %v372_v51, 20.0 }
 0x12d   :  { %v375_v53 = vmul.f32 1.442695, %v373_v52 }
 0x12f   :  { %2644 = vpow2.f32 %v375_v53 }
 0x13c   :  { %v2645_v54 = vpop.eup %2644 }
 0x13d   :  { %v377_v55 = vadd.f32 1.0, %v2645_v54  ;;  %v380_v56 = vmul.f32 -0.5, %v2645_v54  ;;  %v383_v58 = vand.u32 2147483647, %v2645_v54 }
 0x13f   :  { %2646 = vlog2.f32 %v377_v55  ;;  %v381_v57 = vadd.f32 1.0, %v380_v56  ;;  %vm384_vm1 = vcmp.lt.f32.partialorder %v383_v58, 0.0004427343 }
 0x141   :  { %v382_v61 = vmul.f32 %v2645_v54, %v381_v57 }
 0x14c   :  { %v2647_v59 = vpop.eup %2646 }
 0x14d   :  { %v379_v60 = vmul.f32 0.6931472, %v2647_v59 }
 0x14f   :  { %v385_v62 = vsel %vm384_vm1, %v382_v61, %v379_v60  ;;  %v2428_v60 = vld [vmem:[#allocation8 + $0x230] ss:$40 sps:$4 sm:$0xff]   ;;  %v2430_v61 = vld [vmem:[#allocation8 + $0x234] ss:$40 sps:$4 sm:$0xff]  }
 0x150   :  { %v387_v63 = vmul.f32 0.33333334, %v385_v62  ;;  %v2433_v62 = vld [vmem:[#allocation8 + $0x1e4] ss:$40 sps:$4 sm:$0xff]   ;;  %874 = vmatprep.subr.bf16.mxu1 %v2430_v61  ;;  %v2505_v61 = vld [vmem:[#allocation8 + $0x1f4] ss:$40 sps:$4 sm:$0xff]  }
 0x152   :  { %v388_v1 = vsel %vm374_vm2, %v367_v49, %v387_v63  ;;  %v2431_v63 = vld [vmem:[#allocation8 + $0x1e0] ss:$40 sps:$4 sm:$0xff]  }
 0x153   :  { %v405_v2 = vpack.c.bf16 %v388_v1, %v388_v1  ;;  %v2436_v1 = vld [vmem:[#allocation8 + $0x194] ss:$40 sps:$4 sm:$0xff]  }
 0x155   :  { %2322 = vmatmul.mubr.bf16.vlgmr.msra.gmra.mxu0 %v405_v2  ;;  %v2434_v2 = vld [vmem:[#allocation8 + $0x190] ss:$40 sps:$4 sm:$0xff]  }
 0x156   :  { %2361 = vmatprep.mubr.msk.bf16.mxu0 %vm2842_vm0, %v2841_v0  ;;  %2346 = vmatpush3.bf16.msra.mxu0 %v2420_v32 }
 0x157   :  { %2347 = vmatprep.subr.bf16.mxu0 %v2841_v0 }
 0x15a   :  { %2348 = vmatpush3.bf16.msra.mxu0 %v2421_v33 }
 0x15b   :  { %2349 = vmatprep.subr.bf16.mxu0 %v2841_v0 }
 0x15e   :  { %2350 = vmatpush3.bf16.msra.mxu0 %v2422_v34 }
 0x15f   :  { %2351 = vmatprep.subr.bf16.mxu0 %v2841_v0 }
 0x162   :  { %2352 = vmatpush3.bf16.msra.mxu0 %v2423_v35 }
 0x163   :  { %2353 = vmatprep.subr.bf16.mxu0 %v2841_v0 }
 0x166   :  { %2354 = vmatpush3.bf16.msra.mxu0 %v2424_v36  ;;  %v2466_v36 = vld [vmem:[#allocation8 + $0xfc] ss:$40 sps:$4 sm:$0xff]  }
 0x167   :  { %2355 = vmatprep.subr.bf16.mxu0 %v2841_v0 }
 0x16a   :  { %2356 = vmatpush3.bf16.msra.mxu0 %v2425_v37  ;;  %v2464_v37 = vld [vmem:[#allocation8 + $0xf8] ss:$40 sps:$4 sm:$0xff]  }
 0x16b   :  { %2357 = vmatprep.subr.bf16.mxu0 %v2841_v0 }
 0x16e   :  { %2358 = vmatpush3.bf16.msra.mxu0 %v2426_v38  ;;  %v2469_v38 = vld [vmem:[#allocation8 + $0xac] ss:$40 sps:$4 sm:$0xff]  }
 0x16f   :  { %2359 = vmatprep.subr.bf16.mxu0 %v2841_v0 }
 0x172   :  { %2360 = vmatpush3.bf16.msra.mxu0 %v2427_v39  ;;  %v2467_v39 = vld [vmem:[#allocation8 + $0xa8] ss:$40 sps:$4 sm:$0xff]  }
 0x215   :  { %v495_v12 = vpop.f32.mrf.mxu0 }
 0x216   :  { %v496_v13 = vadd.f32 %v2056_v11, %v495_v12  ;;  %v2443_v11 = vld [vmem:[#allocation8 + $0xa0] ss:$40 sps:$4 sm:$0xff]  }
 0x217   :  { %v2323_v14 = vpop.f32.mrf.mxu0 }
 0x218   :  { %v501_v15 = vmul.f32 3.0, %v496_v13 }
 0x219   :  { %v498_v16 = vpop.f32.mrf.mxu0 }
 0x21a   :  { %v502_v17 = vmin.f32 %v501_v15, 20.0  ;;  %vm503_vm4 = vcmp.gt.f32.partialorder %v501_v15, 20.0  ;;  %v2446_v16 = vld [vmem:[#allocation8 + $0x50] ss:$40 sps:$4 sm:$0xff]  }
 0x21b   :  { %v2324_v18 = vpop.f32.mrf.mxu0 }
 0x21c   :  { %v504_v19 = vmul.f32 1.442695, %v502_v17  ;;  %v2451_v17 = vld [vmem:[#allocation8 + $0x4] ss:$40 sps:$4 sm:$0xff]  }
 0x21e   :  { %2648 = vpow2.f32 %v504_v19  ;;  %v2449_v19 = vld [vmem:[#allocation8] ss:$40 sps:$4 sm:$0xff]  }
 0x22b   :  { %v2649_v20 = vpop.eup %2648 }
 0x22c   :  { %v506_v21 = vadd.f32 1.0, %v2649_v20  ;;  %v509_v22 = vmul.f32 -0.5, %v2649_v20  ;;  %v512_v24 = vand.u32 2147483647, %v2649_v20 }
 0x22e   :  { %2650 = vlog2.f32 %v506_v21  ;;  %v510_v23 = vadd.f32 1.0, %v509_v22  ;;  %vm513_vm3 = vcmp.lt.f32.partialorder %v512_v24, 0.0004427343  ;;  %v2454_v21 = vld [vmem:[#allocation8 + $0x23c] ss:$40 sps:$4 sm:$0xff]  }
 0x22f   :  { %v2457_v22 = vld [vmem:[#allocation8 + $0x1ec] ss:$40 sps:$4 sm:$0xff]   ;;  %1153 = vmatprep.subr.bf16.mxu0 %v2454_v21  ;;  %v2460_v24 = vld [vmem:[#allocation8 + $0x19c] ss:$40 sps:$4 sm:$0xff]  }
 0x230   :  { %v511_v27 = vmul.f32 %v2649_v20, %v510_v23  ;;  %v2452_v20 = vld [vmem:[#allocation8 + $0x238] ss:$40 sps:$4 sm:$0xff]   ;;  %v2455_v23 = vld [vmem:[#allocation8 + $0x1e8] ss:$40 sps:$4 sm:$0xff]  }
 0x23b   :  { %v2651_v25 = vpop.eup %2650 }
 0x23c   :  { %v508_v26 = vmul.f32 0.6931472, %v2651_v25  ;;  %v2458_v25 = vld [vmem:[#allocation8 + $0x198] ss:$40 sps:$4 sm:$0xff]  }
 0x23e   :  { %v514_v28 = vsel %vm513_vm3, %v511_v27, %v508_v26  ;;  %v2463_v26 = vld [vmem:[#allocation8 + $0x14c] ss:$40 sps:$4 sm:$0xff]   ;;  %v2461_v27 = vld [vmem:[#allocation8 + $0x148] ss:$40 sps:$4 sm:$0xff]  }
 0x23f   :  { %v515_v29 = vmul.f32 0.33333334, %v514_v28 }
 0x241   :  { %v516_v30 = vsel %vm503_vm4, %v496_v13, %v515_v29  ;;  %v2448_v13 = vld [vmem:[#allocation8 + $0x54] ss:$40 sps:$4 sm:$0xff]  }
 0x242   :  { %v533_v31 = vpack.c.bf16 %v516_v30, %v516_v30 }
 0x244   :  { %2342 = vmatmul.mubr.bf16.vlgmr.msra.gmra.mxu1 %v533_v31  ;;  %v762_v31 = vld [vmem:[#allocation5] sm:$0xff] }
 0x245   :  { %875 = vmatpush1.bf16.msra.mxu1 %v2428_v60  ;;  %906 = vmatprep.mubr.bf16.mxu1 %v2843_v9  ;;  %v2502_v60 = vld [vmem:[#allocation8 + $0x244] ss:$40 sps:$4 sm:$0xff]  }
 0x246   :  { %876 = vmatprep.subr.bf16.mxu1 %v2433_v62  ;;  %v2503_v62 = vld [vmem:[#allocation8 + $0x1f0] ss:$40 sps:$4 sm:$0xff]  }
 0x249   :  { %877 = vmatpush1.bf16.msra.mxu1 %v2431_v63  ;;  %v2508_v63 = vld [vmem:[#allocation8 + $0x1a4] ss:$40 sps:$4 sm:$0xff]  }
 0x24a   :  { %878 = vmatprep.subr.bf16.mxu1 %v2436_v1  ;;  %v2506_v1 = vld [vmem:[#allocation8 + $0x1a0] ss:$40 sps:$4 sm:$0xff]  }
 0x24d   :  { %879 = vmatpush1.bf16.msra.mxu1 %v2434_v2  ;;  %v2511_v2 = vld [vmem:[#allocation8 + $0x154] ss:$40 sps:$4 sm:$0xff]  }
 0x24e   :  { %880 = vmatprep.subr.bf16.mxu1 %v2439_v3  ;;  %v2509_v3 = vld [vmem:[#allocation8 + $0x150] ss:$40 sps:$4 sm:$0xff]  }
 0x251   :  { %881 = vmatpush1.bf16.msra.mxu1 %v2437_v4  ;;  %v784_v4 = vlaneseq }
 0x252   :  { %882 = vmatprep.subr.bf16.mxu1 %v2442_v5 }
 0x253   :  { %v2941_v5 = vshrl.u32 %v784_v4, 7  ;;  %v2544_v4 = vld [vmem:[#allocation8 + $0x2e4] ss:$40 sps:$4 sm:$0xff]  }
 0x255   :  { %883 = vmatpush1.bf16.msra.mxu1 %v2440_v6  ;;  %v2944_v6 = vsub.s32 0, %v2941_v5 }
 0x256   :  { %884 = vmatprep.subr.bf16.mxu1 %v2445_v7  ;;  %v782_v7 = vld [vmem:[#allocation10 + $0x4] sm:$0x3] }
 0x257   :  { %v787_v9 = vrot.slane %v782_v7, %v2944_v6 }
 0x259   :  { %885 = vmatpush1.bf16.msra.mxu1 %v2443_v11 }
 0x25a   :  { %886 = vmatprep.subr.bf16.mxu1 %v2448_v13 }
 0x25d   :  { %887 = vmatpush1.bf16.msra.mxu1 %v2446_v16 }
 0x25e   :  { %888 = vmatprep.subr.bf16.mxu1 %v2451_v17 }
 0x261   :  { %889 = vmatpush1.bf16.msra.mxu1 %v2449_v19 }
 0x262   :  { %1432 = vmatprep.subr.bf16.mxu1 %v2502_v60  ;;  %v2530_v60 = vld [vmem:[#allocation8 + $0x420] ss:$40 sps:$4 sm:$0xff]  }
 0x304   :  { %v623_v41 = vpop.f32.mrf.mxu1 }
 0x305   :  { %v624_v42 = vadd.f32 %v2065_v40, %v623_v41  ;;  %v2472_v40 = vld [vmem:[#allocation8 + $0x5c] ss:$40 sps:$4 sm:$0xff]   ;;  %v2470_v41 = vld [vmem:[#allocation8 + $0x58] ss:$40 sps:$4 sm:$0xff]  }
 0x306   :  { %v2343_v43 = vpop.f32.mrf.mxu1 }
 0x307   :  { %v629_v44 = vmul.f32 3.0, %v624_v42  ;;  %v2473_v43 = vld [vmem:[#allocation8 + $0x8] ss:$40 sps:$4 sm:$0xff]  }
 0x308   :  { %v626_v45 = vpop.f32.mrf.mxu1 }
 0x309   :  { %v630_v46 = vmin.f32 %v629_v44, 20.0  ;;  %vm631_vm6 = vcmp.gt.f32.partialorder %v629_v44, 20.0  ;;  %v2478_v44 = vld [vmem:[#allocation8 + $0x4bc] ss:$40 sps:$4 sm:$0xff]   ;;  %v2476_v45 = vld [vmem:[#allocation8 + $0x4b8] ss:$40 sps:$4 sm:$0xff]  }
 0x30a   :  { %v2344_v47 = vpop.f32.mrf.mxu1 }
 0x30b   :  { %v632_v48 = vmul.f32 1.442695, %v630_v46  ;;  %v2481_v46 = vld [vmem:[#allocation8 + $0x46c] ss:$40 sps:$4 sm:$0xff]   ;;  %v2479_v47 = vld [vmem:[#allocation8 + $0x468] ss:$40 sps:$4 sm:$0xff]  }
 0x30d   :  { %2652 = vpow2.f32 %v632_v48  ;;  %v2484_v48 = vld [vmem:[#allocation8 + $0x41c] ss:$40 sps:$4 sm:$0xff]  }
 0x31a   :  { %v2653_v49 = vpop.eup %2652 }
 0x31b   :  { %v634_v50 = vadd.f32 1.0, %v2653_v49  ;;  %v637_v51 = vmul.f32 -0.5, %v2653_v49  ;;  %v640_v53 = vand.u32 2147483647, %v2653_v49 }
 0x31d   :  { %2654 = vlog2.f32 %v634_v50  ;;  %v638_v52 = vadd.f32 1.0, %v637_v51  ;;  %vm641_vm5 = vcmp.lt.f32.partialorder %v640_v53, 0.0004427343  ;;  %v2487_v50 = vld [vmem:[#allocation8 + $0x3cc] ss:$40 sps:$4 sm:$0xff]  }
 0x31e   :  { %v2485_v51 = vld [vmem:[#allocation8 + $0x3c8] ss:$40 sps:$4 sm:$0xff]   ;;  %v2488_v53 = vld [vmem:[#allocation8 + $0x378] ss:$40 sps:$4 sm:$0xff]  }
 0x31f   :  { %v639_v55 = vmul.f32 %v2653_v49, %v638_v52  ;;  %v2482_v49 = vld [vmem:[#allocation8 + $0x418] ss:$40 sps:$4 sm:$0xff]   ;;  %v2490_v52 = vld [vmem:[#allocation8 + $0x37c] ss:$40 sps:$4 sm:$0xff]  }
 0x32a   :  { %v2655_v54 = vpop.eup %2654 }
 0x32b   :  { %v636_v0 = vmul.f32 0.6931472, %v2655_v54  ;;  %v2493_v54 = vld [vmem:[#allocation8 + $0x32c] ss:$40 sps:$4 sm:$0xff]  }
 0x32d   :  { %v642_v56 = vsel %vm641_vm5, %v639_v55, %v636_v0  ;;  %v2491_v0 = vld [vmem:[#allocation8 + $0x328] ss:$40 sps:$4 sm:$0xff]   ;;  %v2496_v55 = vld [vmem:[#allocation8 + $0x2dc] ss:$40 sps:$4 sm:$0xff]  }
 0x32e   :  { %v643_v57 = vmul.f32 0.33333334, %v642_v56  ;;  %v2494_v56 = vld [vmem:[#allocation8 + $0x2d8] ss:$40 sps:$4 sm:$0xff]  }
 0x330   :  { %v644_v58 = vsel %vm631_vm6, %v624_v42, %v643_v57  ;;  %v2475_v42 = vld [vmem:[#allocation8 + $0xc] ss:$40 sps:$4 sm:$0xff]   ;;  %v2497_v57 = vld [vmem:[#allocation8 + $0x288] ss:$40 sps:$4 sm:$0xff]  }
 0x331   :  { %v661_v59 = vpack.c.bf16 %v644_v58, %v644_v58  ;;  %v2499_v58 = vld [vmem:[#allocation8 + $0x28c] ss:$40 sps:$4 sm:$0xff]  }
 0x333   :  { %2362 = vmatmul.mubr.bf16.vlgmr.msra.gmra.mxu0 %v661_v59  ;;  %v2500_v59 = vld [vmem:[#allocation8 + $0x240] ss:$40 sps:$4 sm:$0xff]  }
 0x334   :  { %1154 = vmatpush1.bf16.msra.mxu0 %v2452_v20 }
 0x335   :  { %1155 = vmatprep.subr.bf16.mxu0 %v2457_v22 }
 0x338   :  { %1156 = vmatpush1.bf16.msra.mxu0 %v2455_v23 }
 0x339   :  { %1157 = vmatprep.subr.bf16.mxu0 %v2460_v24 }
 0x33c   :  { %1158 = vmatpush1.bf16.msra.mxu0 %v2458_v25 }
 0x33d   :  { %1159 = vmatprep.subr.bf16.mxu0 %v2463_v26 }
 0x340   :  { %1160 = vmatpush1.bf16.msra.mxu0 %v2461_v27 }
 0x341   :  { %1161 = vmatprep.subr.bf16.mxu0 %v2466_v36 }
 0x344   :  { %1162 = vmatpush1.bf16.msra.mxu0 %v2464_v37 }
 0x345   :  { %1163 = vmatprep.subr.bf16.mxu0 %v2469_v38 }
 0x348   :  { %1164 = vmatpush1.bf16.msra.mxu0 %v2467_v39 }
 0x349   :  { %1165 = vmatprep.subr.bf16.mxu0 %v2472_v40 }
 0x34c   :  { %1166 = vmatpush1.bf16.msra.mxu0 %v2470_v41 }
 0x34d   :  { %1167 = vmatprep.subr.bf16.mxu0 %v2475_v42 }
 0x350   :  { %1168 = vmatpush1.bf16.msra.mxu0 %v2473_v43 }
 0x351   :  { %1169 = vmatprep.subr.bf16.mxu0 %v2478_v44 }
 0x354   :  { %1170 = vmatpush2.bf16.msra.mxu0 %v2476_v45 }
 0x355   :  { %1171 = vmatprep.subr.bf16.mxu0 %v2481_v46 }
 0x358   :  { %1172 = vmatpush2.bf16.msra.mxu0 %v2479_v47 }
 0x359   :  { %1173 = vmatprep.subr.bf16.mxu0 %v2484_v48  ;;  %v2514_v48 = vld [vmem:[#allocation8 + $0x104] ss:$40 sps:$4 sm:$0xff]  }
 0x35c   :  { %1174 = vmatpush2.bf16.msra.mxu0 %v2482_v49  ;;  %v2512_v49 = vld [vmem:[#allocation8 + $0x100] ss:$40 sps:$4 sm:$0xff]  }
 0x35d   :  { %1175 = vmatprep.subr.bf16.mxu0 %v2487_v50  ;;  %v2517_v50 = vld [vmem:[#allocation8 + $0xb4] ss:$40 sps:$4 sm:$0xff]  }
 0x360   :  { %1176 = vmatpush2.bf16.msra.mxu0 %v2485_v51  ;;  %v2515_v51 = vld [vmem:[#allocation8 + $0xb0] ss:$40 sps:$4 sm:$0xff]  }
 0x361   :  { %1177 = vmatprep.subr.bf16.mxu0 %v2490_v52  ;;  %v2520_v52 = vld [vmem:[#allocation8 + $0x64] ss:$40 sps:$4 sm:$0xff]  }
 0x364   :  { %1178 = vmatpush2.bf16.msra.mxu0 %v2488_v53  ;;  %v2518_v53 = vld [vmem:[#allocation8 + $0x60] ss:$40 sps:$4 sm:$0xff]  }
 0x365   :  { %1179 = vmatprep.subr.bf16.mxu0 %v2493_v54  ;;  %v2523_v54 = vld [vmem:[#allocation8 + $0x14] ss:$40 sps:$4 sm:$0xff]  }
 0x368   :  { %1180 = vmatpush2.bf16.msra.mxu0 %v2491_v0  ;;  %v2521_v0 = vld [vmem:[#allocation8 + $0x10] ss:$40 sps:$4 sm:$0xff]  }
 0x369   :  { %1181 = vmatprep.subr.bf16.mxu0 %v2496_v55  ;;  %v2526_v55 = vld [vmem:[#allocation8 + $0x4c4] ss:$40 sps:$4 sm:$0xff]  }
 0x36c   :  { %1182 = vmatpush2.bf16.msra.mxu0 %v2494_v56  ;;  %v2524_v56 = vld [vmem:[#allocation8 + $0x4c0] ss:$40 sps:$4 sm:$0xff]  }
 0x36d   :  { %1183 = vmatprep.subr.bf16.mxu0 %v2499_v58  ;;  %v2527_v58 = vld [vmem:[#allocation8 + $0x470] ss:$40 sps:$4 sm:$0xff]  }
 0x370   :  { %1184 = vmatpush2.bf16.msra.mxu0 %v2497_v57  ;;  %v2529_v57 = vld [vmem:[#allocation8 + $0x474] ss:$40 sps:$4 sm:$0xff]  }
 0x3f3   :  { %v751_v10 = vpop.f32.mrf.mxu0 }
 0x3f4   :  { %v2937_v12 = vadd.f32 %v2074_v8, %v751_v10  ;;  %v2947_v8 = vsub.s32 1, %v2941_v5 }
 0x3f5   :  { %v2363_v14 = vpop.f32.mrf.mxu0 }
 0x3f6   :  { %757 = vrot.lane.b32.xlu0 %v2937_v12, %s2844_s2  ;;  %v791_v10 = vrot.slane %v782_v7, %v2947_v8  ;;  %v2542_v7 = vld [vmem:[#allocation8 + $0x2e0] ss:$40 sps:$4 sm:$0xff]  }
 0x3f7   :  { %v754_v15 = vpop.f32.mrf.mxu0 }
 0x3f9   :  { %v2364_v18 = vpop.f32.mrf.mxu0 }
 0x468   :  { %v758_v28 = vpop.permute.xlu0 %757 }
 0x469   :  { %v759_v29 = vmul.f32 0.5, %v758_v28 }
 0x46b   :  { %v760_v30 = vmul.f32 1.442695, %v759_v29 }
 0x46d   :  { %2656 = vpow2.f32 %v760_v30 }
 0x47a   :  { %v2657_v32 = vpop.eup %2656 }
 0x47b   :  { %v763_v33 = vmul.f32 %v2657_v32, %v762_v31 }
 0x47d   :  { %v764_v34 = vadd.f32 %v763_v33, %v2937_v12 }
 0x47f   :  { %v781_v35 = vpack.c.bf16 %v764_v34, %v764_v34 }
 0x481   :  { %907 = vmatmul.mubr.bf16.vlgmr.msra.gmra.mxu1 %v781_v35 }
 0x482   :  { %1433 = vmatpush1.bf16.msra.mxu1 %v2500_v59  ;;  %v2532_v59 = vld [vmem:[#allocation8 + $0x424] ss:$40 sps:$4 sm:$0xff]  }
 0x483   :  { %1434 = vmatprep.subr.bf16.mxu1 %v2505_v61  ;;  %v2535_v61 = vld [vmem:[#allocation8 + $0x3d4] ss:$40 sps:$4 sm:$0xff]  }
 0x486   :  { %1435 = vmatpush1.bf16.msra.mxu1 %v2503_v62  ;;  %v2533_v62 = vld [vmem:[#allocation8 + $0x3d0] ss:$40 sps:$4 sm:$0xff]  }
 0x487   :  { %1436 = vmatprep.subr.bf16.mxu1 %v2508_v63  ;;  %v2538_v63 = vld [vmem:[#allocation8 + $0x384] ss:$40 sps:$4 sm:$0xff]  }
 0x48a   :  { %1437 = vmatpush1.bf16.msra.mxu1 %v2506_v1  ;;  %v2536_v1 = vld [vmem:[#allocation8 + $0x380] ss:$40 sps:$4 sm:$0xff]  }
 0x48b   :  { %1438 = vmatprep.subr.bf16.mxu1 %v2511_v2  ;;  %v2541_v2 = vld [vmem:[#allocation8 + $0x334] ss:$40 sps:$4 sm:$0xff]  }
 0x48e   :  { %1439 = vmatpush1.bf16.msra.mxu1 %v2509_v3  ;;  %v2539_v3 = vld [vmem:[#allocation8 + $0x330] ss:$40 sps:$4 sm:$0xff]  }
 0x48f   :  { %1440 = vmatprep.subr.bf16.mxu1 %v2514_v48 }
 0x492   :  { %1441 = vmatpush1.bf16.msra.mxu1 %v2512_v49 }
 0x493   :  { %1442 = vmatprep.subr.bf16.mxu1 %v2517_v50 }
 0x496   :  { %1443 = vmatpush1.bf16.msra.mxu1 %v2515_v51 }
 0x497   :  { %1444 = vmatprep.subr.bf16.mxu1 %v2520_v52 }
 0x49a   :  { %1445 = vmatpush1.bf16.msra.mxu1 %v2518_v53 }
 0x49b   :  { %1446 = vmatprep.subr.bf16.mxu1 %v2523_v54 }
 0x49e   :  { %1447 = vmatpush1.bf16.msra.mxu1 %v2521_v0 }
 0x49f   :  { %1448 = vmatprep.subr.bf16.mxu1 %v2526_v55 }
 0x4a2   :  { %1449 = vmatpush2.bf16.msra.mxu1 %v2524_v56 }
 0x4a3   :  { %1450 = vmatprep.subr.bf16.mxu1 %v2529_v57 }
 0x4a6   :  { %1451 = vmatpush2.bf16.msra.mxu1 %v2527_v58  ;;  %v2551_v58 = vld [vmem:[#allocation8 + $0x250] ss:$40 sps:$4 sm:$0xff]  }
 0x4a7   :  { %1452 = vmatprep.subr.bf16.mxu1 %v2532_v59 }
 0x4aa   :  { %1453 = vmatpush2.bf16.msra.mxu1 %v2530_v60  ;;  %v2559_v60 = vld [vmem:[#allocation8 + $0x204] ss:$40 sps:$4 sm:$0xff]  }
 0x4ab   :  { %1454 = vmatprep.subr.bf16.mxu1 %v2535_v61  ;;  %v2557_v61 = vld [vmem:[#allocation8 + $0x200] ss:$40 sps:$4 sm:$0xff]  }
 0x4ae   :  { %1455 = vmatpush2.bf16.msra.mxu1 %v2533_v62  ;;  %v2565_v62 = vld [vmem:[#allocation8 + $0x1b4] ss:$40 sps:$4 sm:$0xff]  }
 0x4af   :  { %1456 = vmatprep.subr.bf16.mxu1 %v2538_v63  ;;  %v2563_v63 = vld [vmem:[#allocation8 + $0x1b0] ss:$40 sps:$4 sm:$0xff]  }
 0x4b2   :  { %1457 = vmatpush2.bf16.msra.mxu1 %v2536_v1  ;;  %v2571_v1 = vld [vmem:[#allocation8 + $0x164] ss:$40 sps:$4 sm:$0xff]  }
 0x4b3   :  { %1458 = vmatprep.subr.bf16.mxu1 %v2541_v2  ;;  %v2569_v2 = vld [vmem:[#allocation8 + $0x160] ss:$40 sps:$4 sm:$0xff]  }
 0x4b6   :  { %1459 = vmatpush2.bf16.msra.mxu1 %v2539_v3  ;;  %v2574_v3 = vld [vmem:[#allocation8 + $0x10c] ss:$40 sps:$4 sm:$0xff]  }
 0x4b7   :  { %1460 = vmatprep.subr.bf16.mxu1 %v2544_v4  ;;  %v2577_v4 = vld [vmem:[#allocation8 + $0x114] ss:$40 sps:$4 sm:$0xff]  }
 0x4ba   :  { %1461 = vmatpush2.bf16.msra.mxu1 %v2542_v7  ;;  %v2572_v7 = vld [vmem:[#allocation8 + $0x108] ss:$40 sps:$4 sm:$0xff]  }
 0x541   :  { %v908_v11 = vpop.f32.mrf.mxu1 }
 0x542   :  { %v909_v13 = vadd.f32 %v908_v11, %v787_v9  ;;  %v2545_v9 = vld [vmem:[#allocation8 + $0x290] ss:$40 sps:$4 sm:$0xff]  }
 0x543   :  { %v910_v14 = vpop.f32.mrf.mxu1  ;;  %v2548_v11 = vld [vmem:[#allocation8 + $0x248] ss:$40 sps:$4 sm:$0xff]  }
 0x544   :  { %v915_v15 = vmul.f32 3.0, %v909_v13  ;;  %v911_v16 = vadd.f32 %v910_v14, %v791_v10  ;;  %v2547_v10 = vld [vmem:[#allocation8 + $0x294] ss:$40 sps:$4 sm:$0xff]  }
 0x545   :  { %v912_v17 = vpop.f32.mrf.mxu1  ;;  %1462 = vmatprep.subr.bf16.mxu1 %v2547_v10  ;;  %v2553_v14 = vld [vmem:[#allocation8 + $0x254] ss:$40 sps:$4 sm:$0xff]  }
 0x546   :  { %v917_v18 = vmin.f32 %v915_v15, 20.0  ;;  %v916_v19 = vmul.f32 3.0, %v911_v16  ;;  %vm919_vm9 = vcmp.gt.f32.partialorder %v915_v15, 20.0  ;;  %1463 = vmatpush2.bf16.msra.mxu1 %v2545_v9  ;;  %v2556_v15 = vld [vmem:[#allocation8 + $0x1fc] ss:$40 sps:$4 sm:$0xff]  }
 0x547   :  { %v913_v20 = vpop.f32.mrf.mxu1  ;;  %1954 = vmatprep.subr.bf16.mxu1 %v2553_v14  ;;  %v2562_v17 = vld [vmem:[#allocation8 + $0x1ac] ss:$40 sps:$4 sm:$0xff]   ;;  %v2575_v9 = vld [vmem:[#allocation8 + $0x110] ss:$40 sps:$4 sm:$0xff]   ;;  %v2580_v10 = vld [vmem:[#allocation8 + $0xbc] ss:$40 sps:$4 sm:$0xff]  }
 0x548   :  { %v921_v21 = vmul.f32 1.442695, %v917_v18  ;;  %v918_v22 = vmin.f32 %v916_v19, 20.0  ;;  %vm920_vm10 = vcmp.gt.f32.partialorder %v916_v19, 20.0  ;;  %v2560_v18 = vld [vmem:[#allocation8 + $0x1a8] ss:$40 sps:$4 sm:$0xff]  }
 0x549   :  { %v2568_v19 = vld [vmem:[#allocation8 + $0x15c] ss:$40 sps:$4 sm:$0xff]   ;;  %v2566_v20 = vld [vmem:[#allocation8 + $0x158] ss:$40 sps:$4 sm:$0xff]  }
 0x54a   :  { %2658 = vpow2.f32 %v921_v21  ;;  %v923_v23 = vmul.f32 1.442695, %v918_v22  ;;  %v981_v21 = vld [vmem:[#allocation10 + $0x6] sm:$0x3]  ;;  %v2581_v14 = vld [vmem:[#allocation8 + $0xc0] ss:$40 sps:$4 sm:$0xff]  }
 0x54b   :  { %v986_v22 = vrot.slane %v981_v21, %v2944_v6 }
 0x54c   :  { %2660 = vpow2.f32 %v923_v23  ;;  %v990_v23 = vrot.slane %v981_v21, %v2947_v8  ;;  %v2590_v21 = vld [vmem:[#allocation8 + $0x18] ss:$40 sps:$4 sm:$0xff]  }
 0x557   :  { %v2659_v24 = vpop.eup %2658 }
 0x558   :  { %v925_v25 = vadd.f32 1.0, %v2659_v24  ;;  %v928_v28 = vmul.f32 -0.5, %v2659_v24  ;;  %v931_v31 = vand.u32 2147483647, %v2659_v24 }
 0x559   :  { %v2661_v26 = vpop.eup %2660 }
 0x55a   :  { %2662 = vlog2.f32 %v925_v25  ;;  %v934_v27 = vadd.f32 1.0, %v2661_v26  ;;  %v937_v29 = vmul.f32 -0.5, %v2661_v26  ;;  %v929_v30 = vadd.f32 1.0, %v928_v28 }
 0x55b   :  { %v940_v34 = vand.u32 2147483647, %v2661_v26  ;;  %vm932_vm7 = vcmp.lt.f32.partialorder %v931_v31, 0.0004427343 }
 0x55c   :  { %2664 = vlog2.f32 %v934_v27  ;;  %v938_v32 = vadd.f32 1.0, %v937_v29  ;;  %v930_v36 = vmul.f32 %v2659_v24, %v929_v30 }
 0x55d   :  { %vm941_vm8 = vcmp.lt.f32.partialorder %v940_v34, 0.0004427343 }
 0x55e   :  { %v939_v40 = vmul.f32 %v2661_v26, %v938_v32 }
 0x567   :  { %v2663_v33 = vpop.eup %2662 }
 0x568   :  { %v927_v35 = vmul.f32 0.6931472, %v2663_v33 }
 0x569   :  { %v2665_v37 = vpop.eup %2664 }
 0x56a   :  { %v933_v38 = vsel %vm932_vm7, %v930_v36, %v927_v35  ;;  %v936_v39 = vmul.f32 0.6931472, %v2665_v37 }
 0x56b   :  { %v943_v41 = vmul.f32 0.33333334, %v933_v38 }
 0x56c   :  { %v942_v42 = vsel %vm941_vm8, %v939_v40, %v936_v39 }
 0x56d   :  { %v944_v43 = vmul.f32 0.33333334, %v942_v42  ;;  %v945_v44 = vsel %vm919_vm9, %v909_v13, %v943_v41  ;;  %v2550_v13 = vld [vmem:[#allocation8 + $0x24c] ss:$40 sps:$4 sm:$0xff]  }
 0x56e   :  { %v979_v47 = vpack.c.bf16 %v945_v44, %v945_v44  ;;  %1913 = vmatprep.subr.bf16.mxu0 %v2550_v13  ;;  %v2578_v13 = vld [vmem:[#allocation8 + $0xb8] ss:$40 sps:$4 sm:$0xff]  }
 0x56f   :  { %v946_v45 = vsel %vm920_vm10, %v911_v16, %v944_v43  ;;  %v2554_v16 = vld [vmem:[#allocation8 + $0x1f8] ss:$40 sps:$4 sm:$0xff]  }
 0x570   :  { %v980_v46 = vpack.c.bf16 %v946_v45, %v946_v45 }
 0x572   :  { %1185 = vmatprep.mubr.bf16.mxu0 %v980_v46 }
 0x573   :  { %1186 = vmatmul.mubr.bf16.vlgmr.msra.gmra.mxu0 %v979_v47 }
 0x574   :  { %1914 = vmatpush1.bf16.msra.mxu0 %v2548_v11  ;;  %v2583_v11 = vld [vmem:[#allocation8 + $0xc4] ss:$40 sps:$4 sm:$0xff]  }
 0x575   :  { %1915 = vmatprep.subr.bf16.mxu0 %v2556_v15  ;;  %v2586_v15 = vld [vmem:[#allocation8 + $0x6c] ss:$40 sps:$4 sm:$0xff]  }
 0x578   :  { %1916 = vmatpush1.bf16.msra.mxu0 %v2554_v16  ;;  %v2589_v16 = vld [vmem:[#allocation8 + $0x74] ss:$40 sps:$4 sm:$0xff]  }
 0x579   :  { %1917 = vmatprep.subr.bf16.mxu0 %v2562_v17  ;;  %v2584_v17 = vld [vmem:[#allocation8 + $0x68] ss:$40 sps:$4 sm:$0xff]  }
 0x57c   :  { %1918 = vmatpush1.bf16.msra.mxu0 %v2560_v18  ;;  %v2587_v18 = vld [vmem:[#allocation8 + $0x70] ss:$40 sps:$4 sm:$0xff]  }
 0x57d   :  { %1919 = vmatprep.subr.bf16.mxu0 %v2568_v19  ;;  %v2592_v19 = vld [vmem:[#allocation8 + $0x1c] ss:$40 sps:$4 sm:$0xff]  }
 0x580   :  { %1920 = vmatpush1.bf16.msra.mxu0 %v2566_v20  ;;  %v2595_v20 = vld [vmem:[#allocation8 + $0x24] ss:$40 sps:$4 sm:$0xff]  }
 0x581   :  { %1921 = vmatprep.subr.bf16.mxu0 %v2574_v3 }
 0x584   :  { %1922 = vmatpush1.bf16.msra.mxu0 %v2572_v7 }
 0x585   :  { %1923 = vmatprep.subr.bf16.mxu0 %v2580_v10 }
 0x588   :  { %1924 = vmatpush1.bf16.msra.mxu0 %v2578_v13 }
 0x589   :  { %1925 = vmatprep.subr.bf16.mxu0 %v2586_v15 }
 0x58c   :  { %1926 = vmatpush1.bf16.msra.mxu0 %v2584_v17 }
 0x58d   :  { %1927 = vmatprep.subr.bf16.mxu0 %v2592_v19 }
 0x590   :  { %1928 = vmatpush1.bf16.msra.mxu0 %v2590_v21 }
 0x633   :  { %v1187_v24 = vpop.f32.mrf.mxu0 }
 0x634   :  { %v1188_v25 = vadd.f32 %v1187_v24, %v986_v22  ;;  %v2593_v22 = vld [vmem:[#allocation8 + $0x20] ss:$40 sps:$4 sm:$0xff]   ;;  %v2601_v24 = vld [vmem:[#allocation8 + $0x4d4] ss:$40 sps:$4 sm:$0xff]  }
 0x635   :  { %v1189_v26 = vpop.f32.mrf.mxu0 }
 0x636   :  { %v1194_v27 = vmul.f32 3.0, %v1188_v25  ;;  %v1190_v28 = vadd.f32 %v1189_v26, %v990_v23  ;;  %v2598_v23 = vld [vmem:[#allocation8 + $0x4cc] ss:$40 sps:$4 sm:$0xff]   ;;  %v2599_v26 = vld [vmem:[#allocation8 + $0x4d0] ss:$40 sps:$4 sm:$0xff]  }
 0x637   :  { %v1191_v29 = vpop.f32.mrf.mxu0  ;;  %1929 = vmatprep.subr.bf16.mxu0 %v2598_v23 }
 0x638   :  { %v1196_v30 = vmin.f32 %v1194_v27, 20.0  ;;  %v1195_v31 = vmul.f32 3.0, %v1190_v28  ;;  %vm1198_vm13 = vcmp.gt.f32.partialorder %v1194_v27, 20.0  ;;  %v2604_v27 = vld [vmem:[#allocation8 + $0x47c] ss:$40 sps:$4 sm:$0xff]  }
 0x639   :  { %v1192_v32 = vpop.f32.mrf.mxu0  ;;  %v2602_v29 = vld [vmem:[#allocation8 + $0x478] ss:$40 sps:$4 sm:$0xff]  }
 0x63a   :  { %v1200_v33 = vmul.f32 1.442695, %v1196_v30  ;;  %v1197_v34 = vmin.f32 %v1195_v31, 20.0  ;;  %vm1199_vm14 = vcmp.gt.f32.partialorder %v1195_v31, 20.0  ;;  %v2605_v30 = vld [vmem:[#allocation8 + $0x480] ss:$40 sps:$4 sm:$0xff]  }
 0x63b   :  { %v2610_v31 = vld [vmem:[#allocation8 + $0x42c] ss:$40 sps:$4 sm:$0xff]  }
 0x63c   :  { %2666 = vpow2.f32 %v1200_v33  ;;  %v1202_v35 = vmul.f32 1.442695, %v1197_v34  ;;  %v2613_v32 = vld [vmem:[#allocation8 + $0x434] ss:$40 sps:$4 sm:$0xff]   ;;  %v2608_v33 = vld [vmem:[#allocation8 + $0x428] ss:$40 sps:$4 sm:$0xff]  }
 0x63d   :  { %v2611_v34 = vld [vmem:[#allocation8 + $0x430] ss:$40 sps:$4 sm:$0xff]  }
 0x63e   :  { %2668 = vpow2.f32 %v1202_v35  ;;  %v2616_v35 = vld [vmem:[#allocation8 + $0x3dc] ss:$40 sps:$4 sm:$0xff]  }
 0x649   :  { %v2667_v36 = vpop.eup %2666 }
 0x64a   :  { %v1204_v37 = vadd.f32 1.0, %v2667_v36  ;;  %v1207_v40 = vmul.f32 -0.5, %v2667_v36  ;;  %v1210_v43 = vand.u32 2147483647, %v2667_v36 }
 0x64b   :  { %v2669_v38 = vpop.eup %2668 }
 0x64c   :  { %2670 = vlog2.f32 %v1204_v37  ;;  %v1213_v39 = vadd.f32 1.0, %v2669_v38  ;;  %v1216_v41 = vmul.f32 -0.5, %v2669_v38  ;;  %v1208_v42 = vadd.f32 1.0, %v1207_v40  ;;  %v2614_v37 = vld [vmem:[#allocation8 + $0x3d8] ss:$40 sps:$4 sm:$0xff]  }
 0x64d   :  { %v1219_v46 = vand.u32 2147483647, %v2669_v38  ;;  %vm1211_vm11 = vcmp.lt.f32.partialorder %v1210_v43, 0.0004427343  ;;  %v2625_v40 = vld [vmem:[#allocation8 + $0x394] ss:$40 sps:$4 sm:$0xff]  }
 0x64e   :  { %2672 = vlog2.f32 %v1213_v39  ;;  %v1217_v44 = vadd.f32 1.0, %v1216_v41  ;;  %v1209_v48 = vmul.f32 %v2667_v36, %v1208_v42  ;;  %v2619_v36 = vld [vmem:[#allocation8 + $0x3e4] ss:$40 sps:$4 sm:$0xff]   ;;  %v2620_v41 = vld [vmem:[#allocation8 + $0x388] ss:$40 sps:$4 sm:$0xff]  }
 0x64f   :  { %vm1220_vm12 = vcmp.lt.f32.partialorder %v1219_v46, 0.0004427343  ;;  %v2622_v39 = vld [vmem:[#allocation8 + $0x38c] ss:$40 sps:$4 sm:$0xff]   ;;  %v2623_v42 = vld [vmem:[#allocation8 + $0x390] ss:$40 sps:$4 sm:$0xff]  }
 0x650   :  { %v1218_v52 = vmul.f32 %v2669_v38, %v1217_v44  ;;  %v2617_v38 = vld [vmem:[#allocation8 + $0x3e0] ss:$40 sps:$4 sm:$0xff]   ;;  %v2628_v43 = vld [vmem:[#allocation8 + $0x33c] ss:$40 sps:$4 sm:$0xff]  }
 0x651   :  { %v2631_v44 = vld [vmem:[#allocation8 + $0x344] ss:$40 sps:$4 sm:$0xff]   ;;  %v2629_v46 = vld [vmem:[#allocation8 + $0x340] ss:$40 sps:$4 sm:$0xff]  }
 0x659   :  { %v2671_v45 = vpop.eup %2670 }
 0x65a   :  { %v1206_v47 = vmul.f32 0.6931472, %v2671_v45  ;;  %v2626_v45 = vld [vmem:[#allocation8 + $0x338] ss:$40 sps:$4 sm:$0xff]  }
 0x65b   :  { %v2673_v49 = vpop.eup %2672 }
 0x65c   :  { %v1212_v50 = vsel %vm1211_vm11, %v1209_v48, %v1206_v47  ;;  %v1215_v51 = vmul.f32 0.6931472, %v2673_v49  ;;  %v2634_v47 = vld [vmem:[#allocation8 + $0x2ec] ss:$40 sps:$4 sm:$0xff]   ;;  %v2632_v49 = vld [vmem:[#allocation8 + $0x2e8] ss:$40 sps:$4 sm:$0xff]  }
 0x65d   :  { %v1222_v53 = vmul.f32 0.33333334, %v1212_v50  ;;  %v2637_v48 = vld [vmem:[#allocation8 + $0x2f4] ss:$40 sps:$4 sm:$0xff]   ;;  %v2635_v50 = vld [vmem:[#allocation8 + $0x2f0] ss:$40 sps:$4 sm:$0xff]  }
 0x65e   :  { %v1221_v54 = vsel %vm1220_vm12, %v1218_v52, %v1215_v51  ;;  %v2638_v51 = vld [vmem:[#allocation8 + $0x298] ss:$40 sps:$4 sm:$0xff]   ;;  %v2640_v52 = vld [vmem:[#allocation8 + $0x29c] ss:$40 sps:$4 sm:$0xff]  }
 0x65f   :  { %v1223_v0 = vmul.f32 0.33333334, %v1221_v54  ;;  %v1224_v55 = vsel %vm1198_vm13, %v1188_v25, %v1222_v53  ;;  %v2596_v25 = vld [vmem:[#allocation8 + $0x4c8] ss:$40 sps:$4 sm:$0xff]   ;;  %v2643_v54 = vld [vmem:[#allocation8 + $0x2a4] ss:$40 sps:$4 sm:$0xff]  }
 0x660   :  { %v1258_v59 = vpack.c.bf16 %v1224_v55, %v1224_v55  ;;  %1930 = vmatpush2.bf16.msra.mxu0 %v2596_v25  ;;  %v2641_v53 = vld [vmem:[#allocation8 + $0x2a0] ss:$40 sps:$4 sm:$0xff]  }
 0x661   :  { %v1225_v56 = vsel %vm1199_vm14, %v1190_v28, %v1223_v0  ;;  %v2607_v28 = vld [vmem:[#allocation8 + $0x484] ss:$40 sps:$4 sm:$0xff]   ;;  %1931 = vmatprep.subr.bf16.mxu0 %v2604_v27  ;;  %v1260_v0 = vld [vmem:[#allocation10 + $0x8] sm:$0x3] }
 0x662   :  { %v1259_v57 = vpack.c.bf16 %v1225_v56, %v1225_v56  ;;  %v1265_v55 = vrot.slane %v1260_v0, %v2944_v6  ;;  %v1269_v56 = vrot.slane %v1260_v0, %v2947_v8 }
 0x664   :  { %1464 = vmatprep.mubr.bf16.mxu1 %v1259_v57  ;;  %1932 = vmatpush2.bf16.msra.mxu0 %v2602_v29 }
 0x665   :  { %1465 = vmatmul.mubr.bf16.vlgmr.msra.gmra.mxu1 %v1258_v59  ;;  %1933 = vmatprep.subr.bf16.mxu0 %v2610_v31 }
 0x666   :  { %1955 = vmatpush1.bf16.msra.mxu1 %v2551_v58 }
 0x667   :  { %1956 = vmatprep.subr.bf16.mxu1 %v2559_v60 }
 0x668   :  { %1934 = vmatpush2.bf16.msra.mxu0 %v2608_v33 }
 0x669   :  { %1935 = vmatprep.subr.bf16.mxu0 %v2616_v35  ;;  %v1571_v35 = vld [vmem:[#allocation10 + $0xa] sm:$0xf] }
 0x66a   :  { %1957 = vmatpush1.bf16.msra.mxu1 %v2557_v61 }
 0x66b   :  { %1958 = vmatprep.subr.bf16.mxu1 %v2565_v62 }
 0x66c   :  { %1936 = vmatpush2.bf16.msra.mxu0 %v2614_v37  ;;  %v1576_v37 = vrot.slane %v1571_v35, %v2944_v6 }
 0x66d   :  { %1937 = vmatprep.subr.bf16.mxu0 %v2622_v39  ;;  %v1580_v39 = vrot.slane %v1571_v35, %v2947_v8 }
 0x66e   :  { %1959 = vmatpush1.bf16.msra.mxu1 %v2563_v63 }
 0x66f   :  { %1960 = vmatprep.subr.bf16.mxu1 %v2571_v1 }
 0x670   :  { %1938 = vmatpush2.bf16.msra.mxu0 %v2620_v41 }
 0x671   :  { %1939 = vmatprep.subr.bf16.mxu0 %v2628_v43 }
 0x672   :  { %1961 = vmatpush1.bf16.msra.mxu1 %v2569_v2 }
 0x673   :  { %1962 = vmatprep.subr.bf16.mxu1 %v2577_v4 }
 0x674   :  { %1940 = vmatpush2.bf16.msra.mxu0 %v2626_v45 }
 0x675   :  { %1941 = vmatprep.subr.bf16.mxu0 %v2634_v47 }
 0x676   :  { %1963 = vmatpush1.bf16.msra.mxu1 %v2575_v9 }
 0x677   :  { %1964 = vmatprep.subr.bf16.mxu1 %v2583_v11 }
 0x678   :  { %1942 = vmatpush2.bf16.msra.mxu0 %v2632_v49 }
 0x679   :  { %1943 = vmatprep.subr.bf16.mxu0 %v2640_v52 }
 0x67a   :  { %1965 = vmatpush1.bf16.msra.mxu1 %v2581_v14 }
 0x67b   :  { %1966 = vmatprep.subr.bf16.mxu1 %v2589_v16 }
 0x67c   :  { %1944 = vmatpush2.bf16.msra.mxu0 %v2638_v51 }
 0x67e   :  { %1967 = vmatpush1.bf16.msra.mxu1 %v2587_v18 }
 0x67f   :  { %1968 = vmatprep.subr.bf16.mxu1 %v2595_v20 }
 0x682   :  { %1969 = vmatpush1.bf16.msra.mxu1 %v2593_v22 }
 0x683   :  { %1970 = vmatprep.subr.bf16.mxu1 %v2601_v24 }
 0x686   :  { %1971 = vmatpush2.bf16.msra.mxu1 %v2599_v26 }
 0x687   :  { %1972 = vmatprep.subr.bf16.mxu1 %v2607_v28 }
 0x68a   :  { %1973 = vmatpush2.bf16.msra.mxu1 %v2605_v30 }
 0x68b   :  { %1974 = vmatprep.subr.bf16.mxu1 %v2613_v32 }
 0x68e   :  { %1975 = vmatpush2.bf16.msra.mxu1 %v2611_v34  ;;  %v1583_v34 = vsub.s32 2, %v2941_v5 }
 0x68f   :  { %1976 = vmatprep.subr.bf16.mxu1 %v2619_v36  ;;  %v1587_v36 = vsub.s32 3, %v2941_v5 }
 0x692   :  { %1977 = vmatpush2.bf16.msra.mxu1 %v2617_v38  ;;  %v1584_v38 = vrot.slane %v1571_v35, %v1583_v34 }
 0x693   :  { %1978 = vmatprep.subr.bf16.mxu1 %v2625_v40  ;;  %v1588_v40 = vrot.slane %v1571_v35, %v1587_v36 }
 0x696   :  { %1979 = vmatpush2.bf16.msra.mxu1 %v2623_v42 }
 0x697   :  { %1980 = vmatprep.subr.bf16.mxu1 %v2631_v44 }
 0x69a   :  { %1981 = vmatpush2.bf16.msra.mxu1 %v2629_v46 }
 0x69b   :  { %1982 = vmatprep.subr.bf16.mxu1 %v2637_v48 }
 0x69e   :  { %1983 = vmatpush2.bf16.msra.mxu1 %v2635_v50 }
 0x69f   :  { %1984 = vmatprep.subr.bf16.mxu1 %v2643_v54 }
 0x6a2   :  { %1985 = vmatpush2.bf16.msra.mxu1 %v2641_v53 }
 0x725   :  { %v1466_v57 = vpop.f32.mrf.mxu1 }
 0x726   :  { %v1467_v58 = vadd.f32 %v1466_v57, %v1265_v55 }
 0x727   :  { %v1468_v59 = vpop.f32.mrf.mxu1 }
 0x728   :  { %v1473_v60 = vmul.f32 3.0, %v1467_v58  ;;  %v1469_v61 = vadd.f32 %v1468_v59, %v1269_v56 }
 0x729   :  { %v1470_v62 = vpop.f32.mrf.mxu1 }
 0x72a   :  { %v1475_v63 = vmin.f32 %v1473_v60, 20.0  ;;  %v1474_v1 = vmul.f32 3.0, %v1469_v61  ;;  %vm1477_vm1 = vcmp.gt.f32.partialorder %v1473_v60, 20.0 }
 0x72b   :  { %v1471_v2 = vpop.f32.mrf.mxu1 }
 0x72c   :  { %v1479_v3 = vmul.f32 1.442695, %v1475_v63  ;;  %v1476_v4 = vmin.f32 %v1474_v1, 20.0  ;;  %vm1478_vm2 = vcmp.gt.f32.partialorder %v1474_v1, 20.0 }
 0x72e   :  { %2674 = vpow2.f32 %v1479_v3  ;;  %v1481_v7 = vmul.f32 1.442695, %v1476_v4 }
 0x730   :  { %2676 = vpow2.f32 %v1481_v7 }
 0x73b   :  { %v2675_v9 = vpop.eup %2674 }
 0x73c   :  { %v1483_v10 = vadd.f32 1.0, %v2675_v9  ;;  %v1486_v14 = vmul.f32 -0.5, %v2675_v9  ;;  %v1489_v17 = vand.u32 2147483647, %v2675_v9 }
 0x73d   :  { %v2677_v11 = vpop.eup %2676 }
 0x73e   :  { %2678 = vlog2.f32 %v1483_v10  ;;  %v1492_v13 = vadd.f32 1.0, %v2677_v11  ;;  %v1495_v15 = vmul.f32 -0.5, %v2677_v11  ;;  %v1487_v16 = vadd.f32 1.0, %v1486_v14 }
 0x73f   :  { %v1498_v20 = vand.u32 2147483647, %v2677_v11  ;;  %vm1490_vm15 = vcmp.lt.f32.partialorder %v1489_v17, 0.0004427343 }
 0x740   :  { %2680 = vlog2.f32 %v1492_v13  ;;  %v1496_v18 = vadd.f32 1.0, %v1495_v15  ;;  %v1488_v22 = vmul.f32 %v2675_v9, %v1487_v16 }
 0x741   :  { %vm1499_vm0 = vcmp.lt.f32.partialorder %v1498_v20, 0.0004427343 }
 0x742   :  { %v1497_v26 = vmul.f32 %v2677_v11, %v1496_v18 }
 0x74b   :  { %v2679_v19 = vpop.eup %2678 }
 0x74c   :  { %v1485_v21 = vmul.f32 0.6931472, %v2679_v19 }
 0x74d   :  { %v2681_v23 = vpop.eup %2680 }
 0x74e   :  { %v1491_v24 = vsel %vm1490_vm15, %v1488_v22, %v1485_v21  ;;  %v1494_v25 = vmul.f32 0.6931472, %v2681_v23 }
 0x74f   :  { %v1501_v27 = vmul.f32 0.33333334, %v1491_v24 }
 0x750   :  { %v1500_v28 = vsel %vm1499_vm0, %v1497_v26, %v1494_v25 }
 0x751   :  { %v1502_v29 = vmul.f32 0.33333334, %v1500_v28  ;;  %v1503_v30 = vsel %vm1477_vm1, %v1467_v58, %v1501_v27 }
 0x752   :  { %v1569_v33 = vpack.c.bf16 %v1503_v30, %v1503_v30 }
 0x753   :  { %v1504_v31 = vsel %vm1478_vm2, %v1469_v61, %v1502_v29 }
 0x754   :  { %v1570_v32 = vpack.c.bf16 %v1504_v31, %v1504_v31 }
 0x756   :  { %1945 = vmatprep.mubr.bf16.mxu0 %v1570_v32  ;;  %1986 = vmatprep.mubr.bf16.mxu1 %v1570_v32 }
 0x757   :  { %1946 = vmatmul.mubr.bf16.vlgmr.msra.gmra.mxu0 %v1569_v33  ;;  %1987 = vmatmul.mubr.bf16.vlgmr.msra.gmra.mxu1 %v1569_v33 }
 0x817   :  { %v1947_v41 = vpop.f32.mrf.mxu0  ;;  %v1988_v42 = vpop.f32.mrf.mxu1 }
 0x818   :  { %v1948_v43 = vadd.f32 %v1947_v41, %v1576_v37  ;;  %v1989_v44 = vadd.f32 %v1988_v42, %v1584_v38 }
 0x819   :  { %v1949_v45 = vpop.f32.mrf.mxu0  ;;  %v1990_v46 = vpop.f32.mrf.mxu1 }
 0x81a   :  { %1995 = vst [vmem:[#allocation11] sm:$0xff] %v1948_v43  ;;  %1997 = vst [vmem:[#allocation11 + $0x10] sm:$0xff] %v1989_v44  ;;  %v1950_v47 = vadd.f32 %v1949_v45, %v1580_v39  ;;  %v1991_v5 = vadd.f32 %v1990_v46, %v1588_v40 }
 0x81b   :  { %v1951_v6 = vpop.f32.mrf.mxu0  ;;  %v1992_v48 = vpop.f32.mrf.mxu1 }
 0x81c   :  { %1996 = vst [vmem:[#allocation11 + $0x8] sm:$0xff] %v1950_v47  ;;  %v1998_v8 = vadd.f32 %v1991_v5, %v2937_v12 }
 0x81d   :  { %v1952_v49 = vpop.f32.mrf.mxu0  ;;  %v1993_v50 = vpop.f32.mrf.mxu1 }
 0x81e   :  { %2793 = shalt.err (!%p2790_p1)
}
 0x81f   :  { %2009 = dma.vmem_to_hbm [thread:$0]  %s2007_s23, 384, %s2971_s5, [#allocation4]   ;;  %1999 = vst [vmem:[#allocation12] sm:$0xff] %v1998_v8 }
 0x820   :  { %s2802_s29 = scalar_lea.vmem %s2017_s25, 128  ;;  %p2807_p3 = scmp.lt.s32.totalorder %s2017_s25, %s2017_s25 }
 0x821   :  { %p2803_p2 = scmp.ne.s32.totalorder %s2017_s25, %s2802_s29  ;;  %p2808_p4 = scmp.lt.s32.totalorder %s2802_s29, %s2802_s29 }
 0x823   :  { %p2809_p5 = por %p2808_p4, %p2807_p3 }
 0x825   :  { %p2810_p6 = pnand %p2809_p5, %p2803_p2 }
 0x827   :  { %2813 = shalt.err (!%p2810_p6)
}
 0x828   :  { %2019 = dma.vmem_to_hbm [thread:$0]  %s2017_s25, 128, %s2972_s6, [#allocation13]  }
 0x829   :  { %2828 = dma.done.wait [#allocation4], 384  }
 0x82a   :  { %2829 = vsyncadd [#allocation4], 4294966912 }
 0x82b   :  { %2830 = dma.done.wait [#allocation13], 128  }
 0x82c   :  { %2831 = vsyncadd [#allocation13], 4294967168 }
 0x82d   :  { %2026 = vsyncpa [#allocation3], 1 }
 0x82e   :  { %2027 = vsyncpa [#allocation6], 1 }
 0x82f   :  { %2028 = vsyncpa [#allocation9], 1 }
 0x830   :  { %2029 = vsyncpa [#allocation4], 1 }
 0x831   :  { %2030 = vsyncpa [#allocation13], 1 }

</bundles_post_ra>
